<compile_context>
chip_gen: v7x
topology: tpu7x:2x2x1
jax: 0.10.0
libtpu: 0.0.40
codegen_flags: <defaults>
</compile_context>

<pallas_src>
import jax
import jax.numpy as jnp
from jax.experimental import pallas as pl
from jax.experimental.pallas import tpu as pltpu

BN_EPS = 1e-5
COMPUTE_DTYPE = jnp.bfloat16          # MXU operand dtype (accumulation is f32)
_VMEM_LIMIT = 32 * 1024 * 1024        # scoped-VMEM budget safe on v5e/v6e/v7x
FC_N_PAD = 128                        # lane-dense FC output width


def _round_up(x, m):
    return (x + m - 1) // m * m


# ------------------------------------------------------------------ kernels --
def _conv_bn_relu_pool_kernel(p_ref, w_ref, sp_ref, sn_ref, shift_ref, o_ref):
    """Fused 5x5 SAME conv + BatchNorm(eval) + ReLU + 2x2 maxpool.

    p_ref block is [4, K, TM]: the four 2x2 pooling-window offsets stacked,
    K = 25*Cin, TM = lane-dense batch*spatial tile.  o_ref is [Cout, TM].
    maxpool(relu(bn(conv))) == relu(scale_pos*max(acc) + scale_neg*min(acc)
    + shift) because the affine is monotone per channel and ReLU is monotone.
    """
    w = w_ref[...]                                    # [Cout, K] bf16 (resident)

    acc0 = jnp.dot(w, p_ref[0], preferred_element_type=jnp.float32)
    acc1 = jnp.dot(w, p_ref[1], preferred_element_type=jnp.float32)
    acc2 = jnp.dot(w, p_ref[2], preferred_element_type=jnp.float32)
    acc3 = jnp.dot(w, p_ref[3], preferred_element_type=jnp.float32)

    mx = jnp.maximum(jnp.maximum(acc0, acc1), jnp.maximum(acc2, acc3))
    mn = jnp.minimum(jnp.minimum(acc0, acc1), jnp.minimum(acc2, acc3))

    y = sp_ref[...] * mx + sn_ref[...] * mn + shift_ref[...]   # single BN affine
    o_ref[...] = jnp.maximum(y, 0.0).astype(o_ref.dtype)       # ReLU + bf16 store


def _fc_kernel(x_ref, w_ref, b_ref, o_ref):
    o_ref[...] = (jnp.dot(x_ref[...], w_ref[...],
                          preferred_element_type=jnp.float32)
                  + b_ref[...]).astype(o_ref.dtype)


# ----------------------------------------------------------------- wrappers --
def _choose_tile(M, max_tile):
    """Lane tile: multiple of 128, <= max_tile, and (when M allows it) small
    enough that the grid has >= 2 steps so v7x's two TCs / the pipeline are
    actually used."""
    m128 = _round_up(M, 128)
    tm = min(max_tile, m128)
    if m128 >= 256:
        half = _round_up((m128 + 1) // 2, 128)
        tm = min(tm, half)
    return tm


def conv_bn_relu_pool(patches, w_t, scale_pos, scale_neg, shift, *, max_tile=2048):
    """patches: [4, K, M] (COMPUTE_DTYPE) -- one pooling offset per leading idx.
    w_t: [Cout, K] (COMPUTE_DTYPE); scale_pos/scale_neg/shift: [Cout, 1] f32.
    Returns pooled activations [Cout, M] bf16, columns ordered (b, ph, pw)."""
    _, K, M = patches.shape
    Cout = w_t.shape[0]
    tm = _choose_tile(M, max_tile)
    m_pad = _round_up(M, tm)
    if m_pad != M:
        patches = jnp.pad(patches, ((0, 0), (0, 0), (0, m_pad - M)))

    full = lambda a: pl.BlockSpec(a.shape, lambda i: (0,) * a.ndim)

    out = pl.pallas_call(
        _conv_bn_relu_pool_kernel,
        out_shape=jax.ShapeDtypeStruct((Cout, m_pad), COMPUTE_DTYPE),
        grid=(m_pad // tm,),
        in_specs=[pl.BlockSpec((4, K, tm), lambda i: (0, 0, i)),
                  full(w_t), full(scale_pos), full(scale_neg), full(shift)],
        out_specs=pl.BlockSpec((Cout, tm), lambda i: (0, i)),
        compiler_params=pltpu.CompilerParams(
            dimension_semantics=("parallel",),
            vmem_limit_bytes=_VMEM_LIMIT),
    )(patches, w_t, scale_pos, scale_neg, shift)
    return out[:, :M]


def fc(x, w_t, bias_row, n_out=10):
    """x: [B, K] (COMPUTE_DTYPE); w_t: [K, FC_N_PAD]; bias_row: [1, FC_N_PAD] f32.
    Output is computed lane-dense at FC_N_PAD width and sliced to n_out."""
    B, K = x.shape
    Npad = w_t.shape[1]
    tb = min(256, _round_up(B, 8))
    b_pad = _round_up(B, tb)
    if b_pad != B:
        x = jnp.pad(x, ((0, b_pad - B), (0, 0)))
    out = pl.pallas_call(
        _fc_kernel,
        out_shape=jax.ShapeDtypeStruct((b_pad, Npad), jnp.float32),
        grid=(b_pad // tb,),
        in_specs=[pl.BlockSpec((tb, K), lambda i: (i, 0)),
                  pl.BlockSpec((K, Npad), lambda i: (0, 0)),
                  pl.BlockSpec((1, Npad), lambda i: (0, 0))],
        out_specs=pl.BlockSpec((tb, Npad), lambda i: (i, 0)),
        compiler_params=pltpu.CompilerParams(
            dimension_semantics=("parallel",),
            vmem_limit_bytes=_VMEM_LIMIT),
    )(x, w_t, bias_row)
    return out[:B, :n_out]


# ------------------------------------------------------------ patch building --
def pooled_patchesT(x_cnhw, ksize=5, pad=2, pool=2):
    """im2col in transposed (lane-dense) layout for a SAME ksize conv that is
    immediately followed by a pool x pool max-pool.

    x_cnhw: [Cin, B, H, W].  Returns ONE array [pool*pool, Cin*ksize*ksize,
    B*Hp*Wp]: leading axis = pooling-window offset (oy, ox); rows ordered
    (cin, ky, kx) (matching PyTorch's weight.reshape(Cout, -1)); columns
    ordered (b, ph, pw)."""
    Cin, B, H, W = x_cnhw.shape
    Hp, Wp = H // pool, W // pool
    xp = jnp.pad(x_cnhw, ((0, 0), (0, 0), (pad, pad), (pad, pad)))
    offs = []
    for oy in range(pool):
        for ox in range(pool):
            taps = []
            for ky in range(ksize):
                for kx in range(ksize):
                    h0, w0 = oy + ky, ox + kx
                    sl = jax.lax.slice(
                        xp,
                        (0, 0, h0, w0),
                        (Cin, B, h0 + pool * (Hp - 1) + 1, w0 + pool * (Wp - 1) + 1),
                        (1, 1, pool, pool))               # [Cin, B, Hp, Wp]
                    taps.append(sl)
            p = jnp.stack(taps, axis=1)                    # [Cin, k*k, B, Hp, Wp]
            offs.append(p.reshape(Cin * ksize * ksize, B * Hp * Wp))
    return jnp.stack(offs, axis=0)                         # [pool*pool, K, M]


# -------------------------------------------------------------- param prep --
def fold_bn(gamma, beta, mean, var, conv_bias):
    """Fold conv bias + eval-mode BatchNorm into per-channel scale/shift.
    Scale is split into its positive / negative parts so the kernel can apply
    the affine once after the pooling max/min (exact for negative gamma)."""
    inv = 1.0 / jnp.sqrt(var.astype(jnp.float32) + BN_EPS)
    scale = gamma.astype(jnp.float32) * inv
    shift = (beta.astype(jnp.float32)
             + (conv_bias.astype(jnp.float32) - mean.astype(jnp.float32)) * scale)
    return (jnp.maximum(scale, 0.0).reshape(-1, 1),
            jnp.minimum(scale, 0.0).reshape(-1, 1),
            shift.reshape(-1, 1))


def prepare_params(params):
    """One-time layout / folding work, hoisted out of the forward path."""
    sp1, sn1, t1 = fold_bn(params["bn1_g"], params["bn1_b"], params["bn1_m"],
                           params["bn1_v"], params["conv1_b"])
    sp2, sn2, t2 = fold_bn(params["bn2_g"], params["bn2_b"], params["bn2_m"],
                           params["bn2_v"], params["conv2_b"])
    wfc = jnp.transpose(params["fc_w"]).astype(COMPUTE_DTYPE)        # [1568, 10]
    wfc = jnp.pad(wfc, ((0, 0), (0, FC_N_PAD - wfc.shape[1])))       # [1568, 128]
    bfc = jnp.pad(params["fc_b"].astype(jnp.float32),
                  (0, FC_N_PAD - params["fc_b"].shape[0])).reshape(1, FC_N_PAD)
    return {
        "w1t": params["conv1_w"].reshape(16, 25).astype(COMPUTE_DTYPE),
        "sp1": sp1, "sn1": sn1, "t1": t1,
        "w2t": params["conv2_w"].reshape(32, 400).astype(COMPUTE_DTYPE),
        "sp2": sp2, "sn2": sn2, "t2": t2,
        "wfc": wfc, "bfc": bfc,
    }


# ------------------------------------------------------------------ forward --
def net_forward(x_nchw, prep):
    B = x_nchw.shape[0]
    # channels-first "CNHW" working layout; matmul operands in bf16
    x = jnp.transpose(x_nchw, (1, 0, 2, 3)).astype(COMPUTE_DTYPE)   # [1, B, 28, 28]

    # ---- layer 1: fused conv(1->16) + BN + ReLU + maxpool ----
    p1 = pooled_patchesT(x)                                          # [4, 25, B*196]
    y1 = conv_bn_relu_pool(p1, prep["w1t"], prep["sp1"], prep["sn1"],
                           prep["t1"], max_tile=2048)                # [16, B*196] bf16

    # ---- layer 2: fused conv(16->32) + BN + ReLU + maxpool ----
    # max_tile=2048 keeps the double-buffered (4,400,TM) bf16 input (~13 MB)
    # under v7x's 32 MiB scoped VMEM.
    p2 = pooled_patchesT(y1.reshape(16, B, 14, 14))                  # [4, 400, B*49]
    y2 = conv_bn_relu_pool(p2, prep["w2t"], prep["sp2"], prep["sn2"],
                           prep["t2"], max_tile=2048)                # [32, B*49] bf16

    # ---- fc: flatten in PyTorch (C, H, W) order, then linear ----
    feat = jnp.transpose(y2.reshape(32, B, 7, 7), (1, 0, 2, 3)).reshape(B, 32 * 7 * 7)
    return fc(feat, prep["wfc"], prep["bfc"], n_out=10)              # [B, 10]


# ---------------------------------------------------------------- reference --
def net_reference(x_nchw, params):
    """Pure-JAX f32 reference matching the PyTorch module (eval-mode BN)."""
    def layer(x, w, b, g, bb, m, v):
        y = jax.lax.conv_general_dilated(
            x, w, window_strides=(1, 1), padding=((2, 2), (2, 2)),
            dimension_numbers=("NCHW", "OIHW", "NCHW"))
        y = y + b.reshape(1, -1, 1, 1)
        y = ((y - m.reshape(1, -1, 1, 1)) / jnp.sqrt(v.reshape(1, -1, 1, 1) + BN_EPS)
             * g.reshape(1, -1, 1, 1) + bb.reshape(1, -1, 1, 1))
        y = jnp.maximum(y, 0.0)
        return jax.lax.reduce_window(y, -jnp.inf, jax.lax.max,
                                     (1, 1, 2, 2), (1, 1, 2, 2), "VALID")

    x = x_nchw.astype(jnp.float32)
    y = layer(x, params["conv1_w"], params["conv1_b"], params["bn1_g"],
              params["bn1_b"], params["bn1_m"], params["bn1_v"])
    y = layer(y, params["conv2_w"], params["conv2_b"], params["bn2_g"],
              params["bn2_b"], params["bn2_m"], params["bn2_v"])
    feat = y.reshape(y.shape[0], -1)
    return feat @ params["fc_w"].T + params["fc_b"]


# --------------------------------------------------------------------- main --
def init_params(key):
    ks = jax.random.split(key, 8)
    p = {
        "conv1_w": 0.1 * jax.random.normal(ks[0], (16, 1, 5, 5), jnp.float32),
        "conv1_b": 0.1 * jax.random.normal(ks[1], (16,), jnp.float32),
        "bn1_g":   1.0 + 0.1 * jax.random.normal(ks[2], (16,), jnp.float32),
        "bn1_b":   0.1 * jax.random.normal(ks[3], (16,), jnp.float32),
        "bn1_m":   jnp.zeros((16,), jnp.float32),
        "bn1_v":   jnp.ones((16,), jnp.float32),
        "conv2_w": 0.05 * jax.random.normal(ks[4], (32, 16, 5, 5), jnp.float32),
        "conv2_b": 0.1 * jax.random.normal(ks[5], (32,), jnp.float32),
        "bn2_g":   1.0 + 0.1 * jax.random.normal(ks[6], (32,), jnp.float32),
        "bn2_b":   0.1 * jax.random.normal(ks[7], (32,), jnp.float32),
        "bn2_m":   jnp.zeros((32,), jnp.float32),
        "bn2_v":   jnp.ones((32,), jnp.float32),
    }
    kf = jax.random.split(ks[0], 2)
    p["fc_w"] = 0.05 * jax.random.normal(kf[0], (10, 7 * 7 * 32), jnp.float32)
    p["fc_b"] = 0.1 * jax.random.normal(kf[1], (10,), jnp.float32)
    return p


if __name__ == "__main__":
    key = jax.random.PRNGKey(0)
    k_x, k_p = jax.random.split(key)
    # FC expects 7*7*32 features -> spatial 28x28, 1 channel; batch = 2.
    x = jax.random.normal(k_x, (2, 1, 28, 28), jnp.float32)
    params = init_params(k_p)
    prep = prepare_params(params)          # one-time layout work, outside jit

    fwd = jax.jit(net_forward)
    out = jax.block_until_ready(fwd(x, prep))
    assert out.shape == (2, 10), out.shape
    assert bool(jnp.all(jnp.isfinite(out)))

    ref = jax.block_until_ready(net_reference(x, params))
    max_err = float(jnp.max(jnp.abs(out - ref)))
    assert max_err < 0.25, f"max |pallas - reference| = {max_err}"
    print("KERNEL_OK")
</pallas_src>

<mosaic_0001>
module attributes {stable_mosaic.version = 11 : i64} {
  func.func @_conv_bn_relu_pool_kernel(%arg0: i32, %arg1: memref<4x25x256xbf16, #tpu.memory_space<vmem>>, %arg2: memref<16x25xbf16, #tpu.memory_space<vmem>>, %arg3: memref<16x1xf32, #tpu.memory_space<vmem>>, %arg4: memref<16x1xf32, #tpu.memory_space<vmem>>, %arg5: memref<16x1xf32, #tpu.memory_space<vmem>>, %arg6: memref<16x256xbf16, #tpu.memory_space<vmem>>) attributes {dimension_semantics = [#tpu.dimension_semantics<parallel>], iteration_bounds = array<i64: 2>, scalar_prefetch = 0 : i64, scratch_operands = 0 : i64, tpu.core_type = #tpu.core_type<tc>, window_params = [{transform_indices = @transform_0, window_bounds = array<i64: 4, 25, 256>}, {pipeline_mode = #tpu.pipeline_mode<synchronous>, transform_indices = @transform_1, window_bounds = array<i64: 16, 25>}, {pipeline_mode = #tpu.pipeline_mode<synchronous>, transform_indices = @transform_2, window_bounds = array<i64: 16, 1>}, {pipeline_mode = #tpu.pipeline_mode<synchronous>, transform_indices = @transform_3, window_bounds = array<i64: 16, 1>}, {pipeline_mode = #tpu.pipeline_mode<synchronous>, transform_indices = @transform_4, window_bounds = array<i64: 16, 1>}, {transform_indices = @transform_5, window_bounds = array<i64: 16, 256>}]} {
    %c0 = arith.constant 0 : index
    %c0_0 = arith.constant 0 : index
    %0 = vector.load %arg2[%c0, %c0_0] : memref<16x25xbf16, #tpu.memory_space<vmem>>, vector<16x25xbf16>
    %c0_1 = arith.constant 0 : index
    %c0_2 = arith.constant 0 : index
    %c0_3 = arith.constant 0 : index
    %1 = vector.load %arg1[%c0_1, %c0_2, %c0_3] : memref<4x25x256xbf16, #tpu.memory_space<vmem>>, vector<1x25x256xbf16>
    %2 = vector.shape_cast %1 : vector<1x25x256xbf16> to vector<25x256xbf16>
    %cst = arith.constant dense<0.000000e+00> : vector<16x256xf32>
    %3 = tpu.matmul %0, %2, %cst {dimension_numbers = #tpu.dot_dimension_numbers<[1], [0], [0], [1], [0, 0, 1, 1], [], []>} : vector<16x25xbf16>, vector<25x256xbf16>, vector<16x256xf32> -> vector<16x256xf32>
    %c1 = arith.constant 1 : index
    %c0_4 = arith.constant 0 : index
    %c0_5 = arith.constant 0 : index
    %4 = vector.load %arg1[%c1, %c0_4, %c0_5] : memref<4x25x256xbf16, #tpu.memory_space<vmem>>, vector<1x25x256xbf16>
    %5 = vector.shape_cast %4 : vector<1x25x256xbf16> to vector<25x256xbf16>
    %cst_6 = arith.constant dense<0.000000e+00> : vector<16x256xf32>
    %6 = tpu.matmul %0, %5, %cst_6 {dimension_numbers = #tpu.dot_dimension_numbers<[1], [0], [0], [1], [0, 0, 1, 1], [], []>} : vector<16x25xbf16>, vector<25x256xbf16>, vector<16x256xf32> -> vector<16x256xf32>
    %c2 = arith.constant 2 : index
    %c0_7 = arith.constant 0 : index
    %c0_8 = arith.constant 0 : index
    %7 = vector.load %arg1[%c2, %c0_7, %c0_8] : memref<4x25x256xbf16, #tpu.memory_space<vmem>>, vector<1x25x256xbf16>
    %8 = vector.shape_cast %7 : vector<1x25x256xbf16> to vector<25x256xbf16>
    %cst_9 = arith.constant dense<0.000000e+00> : vector<16x256xf32>
    %9 = tpu.matmul %0, %8, %cst_9 {dimension_numbers = #tpu.dot_dimension_numbers<[1], [0], [0], [1], [0, 0, 1, 1], [], []>} : vector<16x25xbf16>, vector<25x256xbf16>, vector<16x256xf32> -> vector<16x256xf32>
    %c3 = arith.constant 3 : index
    %c0_10 = arith.constant 0 : index
    %c0_11 = arith.constant 0 : index
    %10 = vector.load %arg1[%c3, %c0_10, %c0_11] : memref<4x25x256xbf16, #tpu.memory_space<vmem>>, vector<1x25x256xbf16>
    %11 = vector.shape_cast %10 : vector<1x25x256xbf16> to vector<25x256xbf16>
    %cst_12 = arith.constant dense<0.000000e+00> : vector<16x256xf32>
    %12 = tpu.matmul %0, %11, %cst_12 {dimension_numbers = #tpu.dot_dimension_numbers<[1], [0], [0], [1], [0, 0, 1, 1], [], []>} : vector<16x25xbf16>, vector<25x256xbf16>, vector<16x256xf32> -> vector<16x256xf32>
    %13 = arith.maximumf %3, %6 : vector<16x256xf32>
    %14 = arith.maximumf %9, %12 : vector<16x256xf32>
    %15 = arith.maximumf %13, %14 : vector<16x256xf32>
    %16 = arith.minimumf %3, %6 : vector<16x256xf32>
    %17 = arith.minimumf %9, %12 : vector<16x256xf32>
    %18 = arith.minimumf %16, %17 : vector<16x256xf32>
    %c0_13 = arith.constant 0 : index
    %c0_14 = arith.constant 0 : index
    %19 = vector.load %arg3[%c0_13, %c0_14] : memref<16x1xf32, #tpu.memory_space<vmem>>, vector<16x1xf32>
    %20 = vector.broadcast %19 : vector<16x1xf32> to vector<16x256xf32>
    %21 = arith.mulf %20, %15 : vector<16x256xf32>
    %c0_15 = arith.constant 0 : index
    %c0_16 = arith.constant 0 : index
    %22 = vector.load %arg4[%c0_15, %c0_16] : memref<16x1xf32, #tpu.memory_space<vmem>>, vector<16x1xf32>
    %23 = vector.broadcast %22 : vector<16x1xf32> to vector<16x256xf32>
    %24 = arith.mulf %23, %18 : vector<16x256xf32>
    %25 = arith.addf %21, %24 : vector<16x256xf32>
    %c0_17 = arith.constant 0 : index
    %c0_18 = arith.constant 0 : index
    %26 = vector.load %arg5[%c0_17, %c0_18] : memref<16x1xf32, #tpu.memory_space<vmem>>, vector<16x1xf32>
    %27 = vector.broadcast %26 : vector<16x1xf32> to vector<16x256xf32>
    %28 = arith.addf %25, %27 : vector<16x256xf32>
    %cst_19 = arith.constant 0.000000e+00 : f32
    %29 = vector.broadcast %cst_19 : f32 to vector<16x256xf32>
    %30 = arith.maximumf %28, %29 : vector<16x256xf32>
    %31 = arith.truncf %30 : vector<16x256xf32> to vector<16x256xbf16>
    %c0_20 = arith.constant 0 : index
    %c0_21 = arith.constant 0 : index
    %32 = vector.load %arg6[%c0_20, %c0_21] : memref<16x256xbf16, #tpu.memory_space<vmem>>, vector<16x256xbf16>
    tpu.vector_store %arg6[%c0_20, %c0_21], %31 {strides = array<i32>} : memref<16x256xbf16, #tpu.memory_space<vmem>>, vector<16x256xbf16>,
    return
  }
  func.func @transform_0(%arg0: i32) -> (i32, i32, i32) {
    %c0_i32 = arith.constant 0 : i32
    %c0_i32_0 = arith.constant 0 : i32
    %c0_i32_1 = arith.constant 0 : i32
    return %c0_i32, %c0_i32_0, %arg0 : i32, i32, i32
  }
  func.func @transform_1(%arg0: i32) -> (i32, i32) {
    %c0_i32 = arith.constant 0 : i32
    %c0_i32_0 = arith.constant 0 : i32
    %c0_i32_1 = arith.constant 0 : i32
    return %c0_i32, %c0_i32_0 : i32, i32
  }
  func.func @transform_2(%arg0: i32) -> (i32, i32) {
    %c0_i32 = arith.constant 0 : i32
    %c0_i32_0 = arith.constant 0 : i32
    %c0_i32_1 = arith.constant 0 : i32
    return %c0_i32, %c0_i32_0 : i32, i32
  }
  func.func @transform_3(%arg0: i32) -> (i32, i32) {
    %c0_i32 = arith.constant 0 : i32
    %c0_i32_0 = arith.constant 0 : i32
    %c0_i32_1 = arith.constant 0 : i32
    return %c0_i32, %c0_i32_0 : i32, i32
  }
  func.func @transform_4(%arg0: i32) -> (i32, i32) {
    %c0_i32 = arith.constant 0 : i32
    %c0_i32_0 = arith.constant 0 : i32
    %c0_i32_1 = arith.constant 0 : i32
    return %c0_i32, %c0_i32_0 : i32, i32
  }
  func.func @transform_5(%arg0: i32) -> (i32, i32) {
    %c0_i32 = arith.constant 0 : i32
    %c0_i32_0 = arith.constant 0 : i32
    return %c0_i32, %arg0 : i32, i32
  }
}

module attributes {stable_mosaic.version = 11 : i64} {
  func.func @_conv_bn_relu_pool_kernel(%arg0: i32, %arg1: memref<4x400x128xbf16, #tpu.memory_space<vmem>>, %arg2: memref<32x400xbf16, #tpu.memory_space<vmem>>, %arg3: memref<32x1xf32, #tpu.memory_space<vmem>>, %arg4: memref<32x1xf32, #tpu.memory_space<vmem>>, %arg5: memref<32x1xf32, #tpu.memory_space<vmem>>, %arg6: memref<32x128xbf16, #tpu.memory_space<vmem>>) attributes {dimension_semantics = [#tpu.dimension_semantics<parallel>], iteration_bounds = array<i64: 1>, scalar_prefetch = 0 : i64, scratch_operands = 0 : i64, tpu.core_type = #tpu.core_type<tc>, window_params = [{transform_indices = @transform_0, window_bounds = array<i64: 4, 400, 128>}, {pipeline_mode = #tpu.pipeline_mode<synchronous>, transform_indices = @transform_1, window_bounds = array<i64: 32, 400>}, {pipeline_mode = #tpu.pipeline_mode<synchronous>, transform_indices = @transform_2, window_bounds = array<i64: 32, 1>}, {pipeline_mode = #tpu.pipeline_mode<synchronous>, transform_indices = @transform_3, window_bounds = array<i64: 32, 1>}, {pipeline_mode = #tpu.pipeline_mode<synchronous>, transform_indices = @transform_4, window_bounds = array<i64: 32, 1>}, {transform_indices = @transform_5, window_bounds = array<i64: 32, 128>}]} {
    %c0 = arith.constant 0 : index
    %c0_0 = arith.constant 0 : index
    %0 = vector.load %arg2[%c0, %c0_0] : memref<32x400xbf16, #tpu.memory_space<vmem>>, vector<32x400xbf16>
    %c0_1 = arith.constant 0 : index
    %c0_2 = arith.constant 0 : index
    %c0_3 = arith.constant 0 : index
    %1 = vector.load %arg1[%c0_1, %c0_2, %c0_3] : memref<4x400x128xbf16, #tpu.memory_space<vmem>>, vector<1x400x128xbf16>
    %2 = vector.shape_cast %1 : vector<1x400x128xbf16> to vector<400x128xbf16>
    %cst = arith.constant dense<0.000000e+00> : vector<32x128xf32>
    %3 = tpu.matmul %0, %2, %cst {dimension_numbers = #tpu.dot_dimension_numbers<[1], [0], [0], [1], [0, 0, 1, 1], [], []>} : vector<32x400xbf16>, vector<400x128xbf16>, vector<32x128xf32> -> vector<32x128xf32>
    %c1 = arith.constant 1 : index
    %c0_4 = arith.constant 0 : index
    %c0_5 = arith.constant 0 : index
    %4 = vector.load %arg1[%c1, %c0_4, %c0_5] : memref<4x400x128xbf16, #tpu.memory_space<vmem>>, vector<1x400x128xbf16>
    %5 = vector.shape_cast %4 : vector<1x400x128xbf16> to vector<400x128xbf16>
    %cst_6 = arith.constant dense<0.000000e+00> : vector<32x128xf32>
    %6 = tpu.matmul %0, %5, %cst_6 {dimension_numbers = #tpu.dot_dimension_numbers<[1], [0], [0], [1], [0, 0, 1, 1], [], []>} : vector<32x400xbf16>, vector<400x128xbf16>, vector<32x128xf32> -> vector<32x128xf32>
    %c2 = arith.constant 2 : index
    %c0_7 = arith.constant 0 : index
    %c0_8 = arith.constant 0 : index
    %7 = vector.load %arg1[%c2, %c0_7, %c0_8] : memref<4x400x128xbf16, #tpu.memory_space<vmem>>, vector<1x400x128xbf16>
    %8 = vector.shape_cast %7 : vector<1x400x128xbf16> to vector<400x128xbf16>
    %cst_9 = arith.constant dense<0.000000e+00> : vector<32x128xf32>
    %9 = tpu.matmul %0, %8, %cst_9 {dimension_numbers = #tpu.dot_dimension_numbers<[1], [0], [0], [1], [0, 0, 1, 1], [], []>} : vector<32x400xbf16>, vector<400x128xbf16>, vector<32x128xf32> -> vector<32x128xf32>
    %c3 = arith.constant 3 : index
    %c0_10 = arith.constant 0 : index
    %c0_11 = arith.constant 0 : index
    %10 = vector.load %arg1[%c3, %c0_10, %c0_11] : memref<4x400x128xbf16, #tpu.memory_space<vmem>>, vector<1x400x128xbf16>
    %11 = vector.shape_cast %10 : vector<1x400x128xbf16> to vector<400x128xbf16>
    %cst_12 = arith.constant dense<0.000000e+00> : vector<32x128xf32>
    %12 = tpu.matmul %0, %11, %cst_12 {dimension_numbers = #tpu.dot_dimension_numbers<[1], [0], [0], [1], [0, 0, 1, 1], [], []>} : vector<32x400xbf16>, vector<400x128xbf16>, vector<32x128xf32> -> vector<32x128xf32>
    %13 = arith.maximumf %3, %6 : vector<32x128xf32>
    %14 = arith.maximumf %9, %12 : vector<32x128xf32>
    %15 = arith.maximumf %13, %14 : vector<32x128xf32>
    %16 = arith.minimumf %3, %6 : vector<32x128xf32>
    %17 = arith.minimumf %9, %12 : vector<32x128xf32>
    %18 = arith.minimumf %16, %17 : vector<32x128xf32>
    %c0_13 = arith.constant 0 : index
    %c0_14 = arith.constant 0 : index
    %19 = vector.load %arg3[%c0_13, %c0_14] : memref<32x1xf32, #tpu.memory_space<vmem>>, vector<32x1xf32>
    %20 = vector.broadcast %19 : vector<32x1xf32> to vector<32x128xf32>
    %21 = arith.mulf %20, %15 : vector<32x128xf32>
    %c0_15 = arith.constant 0 : index
    %c0_16 = arith.constant 0 : index
    %22 = vector.load %arg4[%c0_15, %c0_16] : memref<32x1xf32, #tpu.memory_space<vmem>>, vector<32x1xf32>
    %23 = vector.broadcast %22 : vector<32x1xf32> to vector<32x128xf32>
    %24 = arith.mulf %23, %18 : vector<32x128xf32>
    %25 = arith.addf %21, %24 : vector<32x128xf32>
    %c0_17 = arith.constant 0 : index
    %c0_18 = arith.constant 0 : index
    %26 = vector.load %arg5[%c0_17, %c0_18] : memref<32x1xf32, #tpu.memory_space<vmem>>, vector<32x1xf32>
    %27 = vector.broadcast %26 : vector<32x1xf32> to vector<32x128xf32>
    %28 = arith.addf %25, %27 : vector<32x128xf32>
    %cst_19 = arith.constant 0.000000e+00 : f32
    %29 = vector.broadcast %cst_19 : f32 to vector<32x128xf32>
    %30 = arith.maximumf %28, %29 : vector<32x128xf32>
    %31 = arith.truncf %30 : vector<32x128xf32> to vector<32x128xbf16>
    %c0_20 = arith.constant 0 : index
    %c0_21 = arith.constant 0 : index
    %32 = vector.load %arg6[%c0_20, %c0_21] : memref<32x128xbf16, #tpu.memory_space<vmem>>, vector<32x128xbf16>
    tpu.vector_store %arg6[%c0_20, %c0_21], %31 {strides = array<i32>} : memref<32x128xbf16, #tpu.memory_space<vmem>>, vector<32x128xbf16>,
    return
  }
  func.func @transform_0(%arg0: i32) -> (i32, i32, i32) {
    %c0_i32 = arith.constant 0 : i32
    %c0_i32_0 = arith.constant 0 : i32
    %c0_i32_1 = arith.constant 0 : i32
    return %c0_i32, %c0_i32_0, %arg0 : i32, i32, i32
  }
  func.func @transform_1(%arg0: i32) -> (i32, i32) {
    %c0_i32 = arith.constant 0 : i32
    %c0_i32_0 = arith.constant 0 : i32
    %c0_i32_1 = arith.constant 0 : i32
    return %c0_i32, %c0_i32_0 : i32, i32
  }
  func.func @transform_2(%arg0: i32) -> (i32, i32) {
    %c0_i32 = arith.constant 0 : i32
    %c0_i32_0 = arith.constant 0 : i32
    %c0_i32_1 = arith.constant 0 : i32
    return %c0_i32, %c0_i32_0 : i32, i32
  }
  func.func @transform_3(%arg0: i32) -> (i32, i32) {
    %c0_i32 = arith.constant 0 : i32
    %c0_i32_0 = arith.constant 0 : i32
    %c0_i32_1 = arith.constant 0 : i32
    return %c0_i32, %c0_i32_0 : i32, i32
  }
  func.func @transform_4(%arg0: i32) -> (i32, i32) {
    %c0_i32 = arith.constant 0 : i32
    %c0_i32_0 = arith.constant 0 : i32
    %c0_i32_1 = arith.constant 0 : i32
    return %c0_i32, %c0_i32_0 : i32, i32
  }
  func.func @transform_5(%arg0: i32) -> (i32, i32) {
    %c0_i32 = arith.constant 0 : i32
    %c0_i32_0 = arith.constant 0 : i32
    return %c0_i32, %arg0 : i32, i32
  }
}

module attributes {stable_mosaic.version = 11 : i64} {
  func.func @_fc_kernel(%arg0: i32, %arg1: memref<8x1568xbf16, #tpu.memory_space<vmem>>, %arg2: memref<1568x128xbf16, #tpu.memory_space<vmem>>, %arg3: memref<1x128xf32, #tpu.memory_space<vmem>>, %arg4: memref<8x128xf32, #tpu.memory_space<vmem>>) attributes {dimension_semantics = [#tpu.dimension_semantics<parallel>], iteration_bounds = array<i64: 1>, scalar_prefetch = 0 : i64, scratch_operands = 0 : i64, tpu.core_type = #tpu.core_type<tc>, window_params = [{transform_indices = @transform_0, window_bounds = array<i64: 8, 1568>}, {pipeline_mode = #tpu.pipeline_mode<synchronous>, transform_indices = @transform_1, window_bounds = array<i64: 1568, 128>}, {pipeline_mode = #tpu.pipeline_mode<synchronous>, transform_indices = @transform_2, window_bounds = array<i64: 1, 128>}, {transform_indices = @transform_3, window_bounds = array<i64: 8, 128>}]} {
    %c0 = arith.constant 0 : index
    %c0_0 = arith.constant 0 : index
    %0 = vector.load %arg1[%c0, %c0_0] : memref<8x1568xbf16, #tpu.memory_space<vmem>>, vector<8x1568xbf16>
    %c0_1 = arith.constant 0 : index
    %c0_2 = arith.constant 0 : index
    %1 = vector.load %arg2[%c0_1, %c0_2] : memref<1568x128xbf16, #tpu.memory_space<vmem>>, vector<1568x128xbf16>
    %cst = arith.constant dense<0.000000e+00> : vector<8x128xf32>
    %2 = tpu.matmul %0, %1, %cst {dimension_numbers = #tpu.dot_dimension_numbers<[1], [0], [0], [1], [0, 0, 1, 1], [], []>} : vector<8x1568xbf16>, vector<1568x128xbf16>, vector<8x128xf32> -> vector<8x128xf32>
    %c0_3 = arith.constant 0 : index
    %c0_4 = arith.constant 0 : index
    %3 = vector.load %arg3[%c0_3, %c0_4] : memref<1x128xf32, #tpu.memory_space<vmem>>, vector<1x128xf32>
    %4 = vector.broadcast %3 : vector<1x128xf32> to vector<8x128xf32>
    %5 = arith.addf %2, %4 : vector<8x128xf32>
    %c0_5 = arith.constant 0 : index
    %c0_6 = arith.constant 0 : index
    %6 = vector.load %arg4[%c0_5, %c0_6] : memref<8x128xf32, #tpu.memory_space<vmem>>, vector<8x128xf32>
    tpu.vector_store %arg4[%c0_5, %c0_6], %5 {strides = array<i32>} : memref<8x128xf32, #tpu.memory_space<vmem>>, vector<8x128xf32>,
    return
  }
  func.func @transform_0(%arg0: i32) -> (i32, i32) {
    %c0_i32 = arith.constant 0 : i32
    %c0_i32_0 = arith.constant 0 : i32
    return %arg0, %c0_i32 : i32, i32
  }
  func.func @transform_1(%arg0: i32) -> (i32, i32) {
    %c0_i32 = arith.constant 0 : i32
    %c0_i32_0 = arith.constant 0 : i32
    %c0_i32_1 = arith.constant 0 : i32
    return %c0_i32, %c0_i32_0 : i32, i32
  }
  func.func @transform_2(%arg0: i32) -> (i32, i32) {
    %c0_i32 = arith.constant 0 : i32
    %c0_i32_0 = arith.constant 0 : i32
    %c0_i32_1 = arith.constant 0 : i32
    return %c0_i32, %c0_i32_0 : i32, i32
  }
  func.func @transform_3(%arg0: i32) -> (i32, i32) {
    %c0_i32 = arith.constant 0 : i32
    %c0_i32_0 = arith.constant 0 : i32
    return %arg0, %c0_i32 : i32, i32
  }
}

</mosaic_0001>

<bundles_post_ra>
// kernel: net_forward.3
= control target key start
LH: loop header
LB: loop body
LE: loop exit
PB: predicated region body
PF: predicated region fallthrough
CT: control target
= control target key end

     0   :  { %s978_s18 = smov 0   ;;  %s980_s19 = smov 0   ;;  %s1104_s0 = inlined_call_operand.vmem [shape: bf16[4,25,512], index: 0, kind: input, shape index: {}]   ;;  %s1105_s1 = inlined_call_operand.vmem [shape: bf16[16,25], index: 1, kind: input, shape index: {}]   ;;  %s1106_s2 = inlined_call_operand.vmem [shape: f32[16,1], index: 2, kind: input, shape index: {}]   ;;  %s1107_s3 = inlined_call_operand.vmem [shape: f32[16,1], index: 3, kind: input, shape index: {}]   ;;  %s1108_s4 = inlined_call_operand.vmem [shape: f32[16,1], index: 4, kind: input, shape index: {}]   ;;  %s1109_s5 = inlined_call_operand.vmem [shape: bf16[16,512], index: 5, kind: output, shape index: {}]  }
   0x1   :  { %s982_s20 = smov 0  }
   0x2 LB: > { %s815_s21 = sadd.s32 4294967295, %s944_s20   ;;  %s995_s22 = sadd.s32 1, %s944_s20   ;;  %s944_s20 = sphi %s982_s20, %s1113_s20   ;;  %s940_s19 = sphi %s980_s19, %s1112_s19   ;;  %s936_s18 = sphi %s978_s18, %s1111_s18  }
   0x3   : > { %s19_s23 = ssub.s32 %s944_s20, %s995_s22  ;;  %s22_s24 = sadd.s32 1, %s940_s19 }
   0x4   : > { %p20_p0 = scmp.eq.s32.totalorder %s19_s23, 0  ;;  %p29_p1 = scmp.ne.s32.totalorder %s940_s19, %s936_s18 }
   0x5   : > { %p30_p2 = scmp.eq.s32.totalorder %s944_s20, 0  ;;  %p143_p3 = scmp.eq.s32.totalorder %s815_s21, 1 }
   0x6   : > { %s1006_s25 = scalar_select %p20_p0, %s940_s19, %s22_s24  }
   0x7   : > { %p31_p4 = por %p30_p2, %p29_p1  ;;  %p1008_p5 = por %p143_p3, %p29_p1 }
   0x8   : > { %p818_p6 = scmp.ge.s32.totalorder %s944_s20, 2 }
   0xa   : > { %177 = sbr.rel (%p818_p6) target bundleno = 29 (0x1d), region = 32 }
  0x11   : > { %180 = sbr.rel (!%p31_p4) target bundleno = 29 (0x1d), region = 36  ;;  %s182_s27 = sand.u32 (%p31_p4), 1, %s940_s19  }
  0x12   : > { %s865_s28 = sshll.u32 (%p31_p4), %s944_s20, 3  ;;  %s819_s29 = sshll.u32 (%p31_p4), %s182_s27, 7 }
  0x13   : > { %s1018_s7 = scalar_lea.vmem (%p31_p4), %s1104_s0, %s865_s28  ;;  %s184_s8 = scalar_lea.vmem (%p31_p4), [#allocation2], %s819_s29 }
  0x14   : > { %v245_v0 = vld [vmem:[%s1018_s7] sm:$0xff] (%p31_p4)  ;;  %v247_v1 = vld [vmem:[%s1018_s7 + $0x10] sm:$0xff] (%p31_p4) }
  0x15   : > { %v249_v2 = vld [vmem:[%s1018_s7 + $0x20] sm:$0xff] (%p31_p4)  ;;  %246 = vst [vmem:[%s184_s8] sm:$0xff] (%p31_p4), %v245_v0  ;;  %248 = vst [vmem:[%s184_s8 + $0x8] sm:$0xff] (%p31_p4), %v247_v1  ;;  %v251_v3 = vld [vmem:[%s1018_s7 + $0x30] sm:$0xff] (%p31_p4) }
  0x16   : > { %250 = vst [vmem:[%s184_s8 + $0x10] sm:$0xff] (%p31_p4), %v249_v2  ;;  %v253_v4 = vld [vmem:[%s1018_s7 + $0x40] sm:$0xff] (%p31_p4)  ;;  %v255_v5 = vld [vmem:[%s1018_s7 + $0x50] sm:$0xff] (%p31_p4)  ;;  %252 = vst [vmem:[%s184_s8 + $0x18] sm:$0xff] (%p31_p4), %v251_v3 }
  0x17   : > { %254 = vst [vmem:[%s184_s8 + $0x20] sm:$0xff] (%p31_p4), %v253_v4  ;;  %256 = vst [vmem:[%s184_s8 + $0x28] sm:$0xff] (%p31_p4), %v255_v5  ;;  %v257_v6 = vld [vmem:[%s1018_s7 + $0x60] sm:$0xff] (%p31_p4)  ;;  %v259_v7 = vld [vmem:[%s1018_s7 + $0x70] sm:$0xff] (%p31_p4) }
  0x18   : > { %v261_v8 = vld [vmem:[%s1018_s7 + $0x80] sm:$0xff]  ;;  %258 = vst [vmem:[%s184_s8 + $0x30] sm:$0xff] %v257_v6  ;;  %260 = vst [vmem:[%s184_s8 + $0x38] sm:$0xff] %v259_v7  ;;  %v263_v9 = vld [vmem:[%s1018_s7 + $0x90] sm:$0xff] }
  0x19   : > { %262 = vst [vmem:[%s184_s8 + $0x40] sm:$0xff] %v261_v8  ;;  %v265_v10 = vld [vmem:[%s1018_s7 + $0xa0] sm:$0xff]  ;;  %v267_v11 = vld [vmem:[%s1018_s7 + $0xb0] sm:$0xff]  ;;  %264 = vst [vmem:[%s184_s8 + $0x48] sm:$0xff] %v263_v9 }
  0x1a   : > { %266 = vst [vmem:[%s184_s8 + $0x50] sm:$0xff] %v265_v10  ;;  %268 = vst [vmem:[%s184_s8 + $0x58] sm:$0xff] %v267_v11  ;;  %v269_v12 = vld [vmem:[%s1018_s7 + $0xc0] sm:$0xff]  ;;  %v271_v13 = vld [vmem:[%s1018_s7 + $0xd0] sm:$0xff] }
  0x1b   : > { %v273_v14 = vld [vmem:[%s1018_s7 + $0xe0] sm:$0xff]  ;;  %270 = vst [vmem:[%s184_s8 + $0x60] sm:$0xff] %v269_v12  ;;  %272 = vst [vmem:[%s184_s8 + $0x68] sm:$0xff] %v271_v13  ;;  %v275_v15 = vld [vmem:[%s1018_s7 + $0xf0] sm:$0xff] }
  0x1c   : > { %274 = vst [vmem:[%s184_s8 + $0x70] sm:$0xff] %v273_v14  ;;  %276 = vst [vmem:[%s184_s8 + $0x78] sm:$0xff] %v275_v15 }
  0x1d PF: > { %p822_p7 = scmp.ge.s32.totalorder %s944_s20, 1  ;;  %p281_p8 = scmp.lt.s32.totalorder %s944_s20, 3 }
  0x1f   : > { %p282_p9 = pnand %p822_p7, %p281_p8 }
  0x20   : > { %s288_s9 = sand.u32 (!%p282_p9), 1, %s936_s18   ;;  %vm350_vm0 = vcmask (!%p282_p9), 1043456   ;;  %v946_v16 = vmov (!%p282_p9), 0   ;;  %vm351_vm1 = vcmask (!%p282_p9), 1044480   ;;  %v947_v17 = vmov (!%p282_p9), 65535   ;;  %v659_v19 = vld [vmem:[%s1107_s3] sm:$0xff] (!%p282_p9) }
  0x21   : > { %285 = sbr.rel (%p282_p9) target bundleno = 291 (0x123), region = 74  ;;  %s823_s10 = sshll.u32 (!%p282_p9), %s288_s9, 7  ;;  %392 = vmatprep.mubr.bf16.mxu0 (!%p282_p9), %v946_v16  ;;  %464 = vmatprep.mubr.bf16.mxu1 (!%p282_p9), %v946_v16  ;;  %v352_v18 = vsel (!%p282_p9), %vm350_vm0, 4294967295, %v947_v17  ;;  %v643_v20 = vld [vmem:[%s1106_s2] sm:$0xff] (!%p282_p9)  ;;  %v660_v22 = vld [vmem:[%s1107_s3 + $0x8] sm:$0xff] (!%p282_p9)  ;;  %vm346_vm2 = vcmask (!%p282_p9), 203776  }
  0x22   : > { %896 = vset.pattern.permute.xlu1 (!%p282_p9), %v946_v16  ;;  %895 = vset.pattern.permute.xlu0 (!%p282_p9), %v946_v16  ;;  %s1047_s15 = scalar_lea.vmem (!%p282_p9), [#allocation2], %s823_s10  ;;  %v353_v26 = vsel (!%p282_p9), %vm351_vm1, %v352_v18, 0  ;;  %v909_v33 = vld [vmem:[%s1105_s1] sm:$0xff] (!%p282_p9)   ;;  %v644_v48 = vld [vmem:[%s1106_s2 + $0x8] sm:$0xff] (!%p282_p9)  ;;  %s824_s8 = sshll.u32 (!%p282_p9), %s288_s9, 4 }
  0x23   : > { %v897_v21 = vld [vmem:[%s1047_s15 + $0x4] ss:$8 sps:$4 sm:$0xff] (!%p282_p9)   ;;  %663 = vperm.xlu1 (!%p282_p9), %896, %v659_v19   ;;  %647 = vperm.xlu0 (!%p282_p9), %895, %v643_v20   ;;  %v901_v24 = vld [vmem:[%s1047_s15] ss:$8 sps:$4 sm:$0xff] (!%p282_p9)   ;;  %s313_s10 = scalar_lea.vmem (!%p282_p9), [#allocation3], %s824_s8 }
  0x24   : > { %v899_v23 = vld [vmem:[%s1047_s15 + $0x24] ss:$8 sps:$4 sm:$0xff] (!%p282_p9)   ;;  %360 = vmatprep.subr.bf16.mxu0 (!%p282_p9), %v897_v21  ;;  %v902_v25 = vld [vmem:[%s1047_s15 + $0x20] ss:$8 sps:$4 sm:$0xff] (!%p282_p9)  }
  0x25   : > { %432 = vmatprep.subr.bf16.mxu1 (!%p282_p9), %v899_v23  ;;  %v903_v27 = vld [vmem:[%s1047_s15 + $0x14] ss:$8 sps:$4 sm:$0x1f] (!%p282_p9)   ;;  %361 = vmatpush1.bf16.msra.mxu0 (!%p282_p9), %v901_v24  ;;  %v907_v30 = vld [vmem:[%s1047_s15 + $0x10] ss:$8 sps:$4 sm:$0x1f] (!%p282_p9)  }
  0x26   : > { %433 = vmatpush1.bf16.msra.mxu1 (!%p282_p9), %v902_v25  ;;  %v905_v28 = vld [vmem:[%s1047_s15 + $0x34] ss:$8 sps:$4 sm:$0x1f] (!%p282_p9)   ;;  %v358_v29 = vand.u32 (!%p282_p9), %v903_v27, %v353_v26  ;;  %v908_v31 = vld [vmem:[%s1047_s15 + $0x30] ss:$8 sps:$4 sm:$0x1f] (!%p282_p9)   ;;  %v355_v35 = vand.u32 (!%p282_p9), %v907_v30, %v353_v26 }
  0x27   : > { %668 = vperm.xlu1 (!%p282_p9), %896, %v660_v22   ;;  %v430_v32 = vand.u32 (!%p282_p9), %v905_v28, %v353_v26  ;;  %v912_v34 = vld [vmem:[%s1047_s15 + $0x44] ss:$8 sps:$4 sm:$0xff] (!%p282_p9)   ;;  %v427_v36 = vand.u32 (!%p282_p9), %v908_v31, %v353_v26  ;;  %v910_v37 = vld [vmem:[%s1047_s15 + $0x40] ss:$8 sps:$4 sm:$0xff] (!%p282_p9)   ;;  %652 = vperm.xlu0 (!%p282_p9), %895, %v644_v48  }
  0x28   : > { %362 = vmatprep.subr.bf16.mxu0 %v358_v29  ;;  %v913_v38 = vld [vmem:[%s1047_s15 + $0x60] ss:$8 sps:$4 sm:$0xff]   ;;  %v915_v39 = vld [vmem:[%s1047_s15 + $0x64] ss:$8 sps:$4 sm:$0xff]   ;;  %s868_s18 = sshll.u32 (%p1008_p5), %s815_s21, 3 }
  0x29   : > { %434 = vmatprep.subr.bf16.mxu1 %v430_v32  ;;  %363 = vmatpush1.bf16.msra.mxu0 %v355_v35  ;;  %v916_v40 = vld [vmem:[%s1047_s15 + $0x50] ss:$8 sps:$4 sm:$0x1f]   ;;  %v918_v41 = vld [vmem:[%s1047_s15 + $0x54] ss:$8 sps:$4 sm:$0x1f]   ;;  %s722_s12 = scalar_lea.vmem (%p1008_p5), %s1109_s5, %s868_s18 }
  0x2a   : > { %435 = vmatpush1.bf16.msra.mxu1 %v427_v36  ;;  %504 = vmatprep.subr.bf16.mxu0 %v912_v34  ;;  %v919_v42 = vld [vmem:[%s1047_s15 + $0x70] ss:$8 sps:$4 sm:$0x1f]   ;;  %v502_v43 = vand.u32 %v918_v41, %v353_v26  ;;  %v921_v44 = vld [vmem:[%s1047_s15 + $0x74] ss:$8 sps:$4 sm:$0x1f]   ;;  %v499_v46 = vand.u32 %v916_v40, %v353_v26 }
  0x2b   : > { %576 = vmatprep.subr.bf16.mxu1 %v915_v39  ;;  %v574_v45 = vand.u32 %v921_v44, %v353_v26  ;;  %v571_v47 = vand.u32 %v919_v42, %v353_v26  ;;  %v680_v49 = vld [vmem:[%s1108_s4 + $0x8] sm:$0xff]  ;;  %v679_v50 = vld [vmem:[%s1108_s4] sm:$0xff] }
  0x2c   : > { %830 = vmatmul.mubr.msk.bf16.vlgmr.msra.gmra.mrb[0].mxu0 %vm346_vm2, %v909_v33  ;;  %688 = vperm.xlu1 %896, %v680_v49  }
  0x2d   : > { %839 = vmatmul.mubr.msk.bf16.vlgmr.msra.gmra.mrb[0].mxu1 %vm346_vm2, %v909_v33  ;;  %505 = vmatpush1.bf16.msra.mxu0 %v910_v37 }
  0x2e   : > { %577 = vmatpush1.bf16.msra.mxu1 %v913_v38  ;;  %506 = vmatprep.subr.bf16.mxu0 %v502_v43 }
  0x2f   : > { %536 = vmatprep.mubr.bf16.mxu0 %v946_v16  ;;  %578 = vmatprep.subr.bf16.mxu1 %v574_v45 }
  0x30   : > { %608 = vmatprep.mubr.bf16.mxu1 %v946_v16  ;;  %683 = vperm.xlu0 %895, %v679_v50  }
  0x31   : > { %507 = vmatpush1.bf16.msra.mxu0 %v499_v46 }
  0x32   : > { %579 = vmatpush1.bf16.msra.mxu1 %v571_v47 }
  0x34   : > { %848 = vmatmul.mubr.msk.bf16.vlgmr.msra.gmra.mrb[4].mxu0 %vm346_vm2, %v909_v33 }
  0x35   : > { %857 = vmatmul.mubr.msk.bf16.vlgmr.msra.gmra.mrb[4].mxu1 %vm346_vm2, %v909_v33 }
  0xa2   : > { %v648_v51 = vpop.permute.xlu0 %647  ;;  %v664_v4 = vpop.permute.xlu1 %663 }
  0xa6   : > { %v653_v5 = vpop.permute.xlu0 %652  ;;  %v669_v22 = vpop.permute.xlu1 %668 }
  0xab   : > { %v689_v44 = vpop.permute.xlu1 %688 }
  0xaf   : > { %v684_v40 = vpop.permute.xlu0 %683 }
  0xff   : > { %v394_v52 = vpop.f32.mrb[0].mxu0 }
 0x100   : > { %v466_v53 = vpop.f32.mrb[0].mxu1  ;;  %v396_v56 = vpop.f32.mrb[1].mxu0 }
 0x101   : > { %v619_v54 = vmax.f32 %v394_v52, %v466_v53  ;;  %v631_v55 = vmin.f32 %v394_v52, %v466_v53  ;;  %v468_v57 = vpop.f32.mrb[1].mxu1  ;;  %v398_v60 = vpop.f32.mrb[2].mxu0 }
 0x102   : > { %v620_v58 = vmax.f32 %v396_v56, %v468_v57  ;;  %v632_v59 = vmin.f32 %v396_v56, %v468_v57  ;;  %v470_v61 = vpop.f32.mrb[2].mxu1  ;;  %v400_v0 = vpop.f32.mrb[3].mxu0 }
 0x103   : > { %v621_v62 = vmax.f32 %v398_v60, %v470_v61  ;;  %v633_v63 = vmin.f32 %v398_v60, %v470_v61  ;;  %v472_v1 = vpop.f32.mrb[3].mxu1 }
 0x104   : > { %v622_v2 = vmax.f32 %v400_v0, %v472_v1  ;;  %v634_v3 = vmin.f32 %v400_v0, %v472_v1 }
 0x107   : > { %v538_v6 = vpop.f32.mrb[4].mxu0 }
 0x108   : > { %v610_v7 = vpop.f32.mrb[4].mxu1  ;;  %v540_v10 = vpop.f32.mrb[5].mxu0 }
 0x109   : > { %v623_v8 = vmax.f32 %v538_v6, %v610_v7  ;;  %v635_v9 = vmin.f32 %v538_v6, %v610_v7  ;;  %v612_v11 = vpop.f32.mrb[5].mxu1  ;;  %v542_v14 = vpop.f32.mrb[6].mxu0 }
 0x10a   : > { %v624_v12 = vmax.f32 %v540_v10, %v612_v11  ;;  %v636_v13 = vmin.f32 %v540_v10, %v612_v11  ;;  %v614_v15 = vpop.f32.mrb[6].mxu1  ;;  %v544_v20 = vpop.f32.mrb[7].mxu0 }
 0x10b   : > { %v627_v16 = vmax.f32 %v619_v54, %v623_v8  ;;  %v639_v17 = vmin.f32 %v631_v55, %v635_v9  ;;  %v625_v18 = vmax.f32 %v542_v14, %v614_v15  ;;  %v637_v19 = vmin.f32 %v542_v14, %v614_v15  ;;  %v616_v21 = vpop.f32.mrb[7].mxu1 }
 0x10c   : > { %v628_v23 = vmax.f32 %v620_v58, %v624_v12  ;;  %v640_v24 = vmin.f32 %v632_v59, %v636_v13  ;;  %v626_v25 = vmax.f32 %v544_v20, %v616_v21  ;;  %v638_v26 = vmin.f32 %v544_v20, %v616_v21 }
 0x10d   : > { %v629_v27 = vmax.f32 %v621_v62, %v625_v18  ;;  %v641_v28 = vmin.f32 %v633_v63, %v637_v19  ;;  %v655_v29 = vmul.f32 %v648_v51, %v627_v16  ;;  %v671_v30 = vmul.f32 %v664_v4, %v639_v17 }
 0x10e   : > { %v630_v31 = vmax.f32 %v622_v2, %v626_v25  ;;  %v642_v32 = vmin.f32 %v634_v3, %v638_v26  ;;  %v656_v33 = vmul.f32 %v648_v51, %v628_v23  ;;  %v672_v34 = vmul.f32 %v664_v4, %v640_v24 }
 0x10f   : > { %v657_v35 = vmul.f32 %v653_v5, %v629_v27  ;;  %v673_v36 = vmul.f32 %v669_v22, %v641_v28  ;;  %v675_v37 = vadd.f32 %v671_v30, %v655_v29 }
 0x110   : > { %v658_v38 = vmul.f32 %v653_v5, %v630_v31  ;;  %v674_v39 = vmul.f32 %v669_v22, %v642_v32  ;;  %v676_v41 = vadd.f32 %v672_v34, %v656_v33 }
 0x111   : > { %v677_v42 = vadd.f32 %v673_v36, %v657_v35  ;;  %v691_v43 = vadd.f32 %v684_v40, %v675_v37 }
 0x112   : > { %v678_v45 = vadd.f32 %v674_v39, %v658_v38  ;;  %v692_v46 = vadd.f32 %v684_v40, %v676_v41 }
 0x113   : > { %v693_v47 = vadd.f32 %v689_v44, %v677_v42  ;;  %v695_v48 = vmax.f32 %v691_v43, 0.0 }
 0x114   : > { %v694_v49 = vadd.f32 %v689_v44, %v678_v45  ;;  %v696_v50 = vmax.f32 %v692_v46, 0.0  ;;  %719 = sbr.rel (!%p1008_p5) target bundleno = 291 (0x123), region = 82 }
 0x115   : > { %v697_v51 = vmax.f32 %v693_v47, 0.0 }
 0x116   : > { %v698_v52 = vmax.f32 %v694_v49, 0.0  ;;  %v866_v53 = vpack.c.bf16 %v696_v50, %v695_v48 }
 0x118   : > { %v867_v54 = vpack.c.bf16 %v698_v52, %v697_v51  ;;  %711 = vst [vmem:[%s313_s10] sm:$0xff] %v866_v53 }
 0x11a   : > { %712 = vst [vmem:[%s313_s10 + $0x8] sm:$0xff] %v867_v54 }
 0x11f   : > { %v752_v55 = vld [vmem:[%s313_s10] sm:$0xff] }
 0x120   : > { %753 = vst [vmem:[%s722_s12] sm:$0xff] %v752_v55 }
 0x121   : > { %v754_v56 = vld [vmem:[%s313_s10 + $0x8] sm:$0xff] }
 0x122   : > { %755 = vst [vmem:[%s722_s12 + $0x10] sm:$0xff] %v754_v56 }
 0x123 PF: > { %p12_p10 = scmp.ge.s32.totalorder %s995_s22, 4   ;;  %s1111_s18 = smov %s940_s19 }
 0x124   : > { %s1112_s19 = smov %s1006_s25  ;;  %s1113_s20 = smov %s995_s22 }
 0x125   :  { %14 = sbr.rel (!%p12_p10) target bundleno = 2 (0x2), region = 154 }

// kernel: net_forward.4
= control target key start
LH: loop header
LB: loop body
LE: loop exit
PB: predicated region body
PF: predicated region fallthrough
CT: control target
= control target key end

     0   :  { %v1921_v0 = vmov 0   ;;  %vm267_vm0 = vcmask 130048   ;;  %s2472_s0 = inlined_call_operand.vmem [shape: bf16[4,400,128], index: 0, kind: input, shape index: {}]   ;;  %s2473_s1 = inlined_call_operand.vmem [shape: bf16[32,400], index: 1, kind: input, shape index: {}]   ;;  %s2474_s2 = inlined_call_operand.vmem [shape: f32[32,1], index: 2, kind: input, shape index: {}]   ;;  %s2475_s3 = inlined_call_operand.vmem [shape: f32[32,1], index: 3, kind: input, shape index: {}]   ;;  %s2476_s4 = inlined_call_operand.vmem [shape: f32[32,1], index: 4, kind: input, shape index: {}]   ;;  %s2477_s5 = inlined_call_operand.vmem [shape: bf16[32,128], index: 5, kind: output, shape index: {}]  }
   0x1   :  { %323 = vmatprep.subr.bf16.mxu1 %v1921_v0  ;;  %v1809_v1 = vld [vmem:[%s2472_s0 + $0x40] sm:$0xff]   ;;  %1808 = vset.pattern.permute.xlu1 %v1921_v0  ;;  %v1812_v4 = vld [vmem:[%s2472_s0 + $0x48] sm:$0xff]   ;;  %v1815_v7 = vld [vmem:[%s2472_s0 + $0x50] sm:$0xff]  }
   0x2   :  { %v1810_v2 = vld [vmem:[%s2472_s0 + $0x80] sm:$0xff]   ;;  %1807 = vset.pattern.permute.xlu0 %v1921_v0  ;;  %1694 = vmatprep.subr.bf16.mxu0 %v1809_v1  ;;  %v1813_v5 = vld [vmem:[%s2472_s0 + $0x88] sm:$0xff]   ;;  %v1816_v8 = vld [vmem:[%s2472_s0 + $0x90] sm:$0xff]  }
   0x3   :  { %v1811_v3 = vld [vmem:[%s2472_s0] sm:$0xff]   ;;  %324 = vmatpush1.bf16.msra.mxu1 %v1810_v2  ;;  %v1814_v6 = vld [vmem:[%s2472_s0 + $0x8] sm:$0xff]   ;;  %v1817_v9 = vld [vmem:[%s2472_s0 + $0x10] sm:$0xff]  }
   0x4   :  { %1695 = vmatpush3.bf16.msra.mxu0 %v1811_v3  ;;  %325 = vmatprep.subr.bf16.mxu1 %v1921_v0  ;;  %v1818_v10 = vld [vmem:[%s2472_s0 + $0x58] sm:$0xff]   ;;  %v1821_v13 = vld [vmem:[%s2472_s0 + $0x60] sm:$0xff]   ;;  %v1824_v16 = vld [vmem:[%s2472_s0 + $0x68] sm:$0xff]  }
   0x5   :  { %1696 = vmatprep.subr.bf16.mxu0 %v1812_v4  ;;  %v1819_v11 = vld [vmem:[%s2472_s0 + $0x98] sm:$0xff]   ;;  %v1822_v14 = vld [vmem:[%s2472_s0 + $0xa0] sm:$0xff]   ;;  %v1825_v17 = vld [vmem:[%s2472_s0 + $0xa8] sm:$0xff]  }
   0x6   :  { %v1820_v12 = vld [vmem:[%s2472_s0 + $0x18] sm:$0xff]   ;;  %v1823_v15 = vld [vmem:[%s2472_s0 + $0x20] sm:$0xff]   ;;  %v1826_v18 = vld [vmem:[%s2472_s0 + $0x28] sm:$0xff]  }
   0x7   :  { %326 = vmatpush1.bf16.msra.mxu1 %v1813_v5  ;;  %v1827_v19 = vld [vmem:[%s2472_s0 + $0x70] sm:$0xff]   ;;  %v1830_v23 = vld [vmem:[%s2472_s0 + $0x78] sm:$0xff]   ;;  %v1840_v27 = vld [vmem:[%s2472_s0 + $0x108] sm:$0xff]  }
   0x8   :  { %1697 = vmatpush3.bf16.msra.mxu0 %v1814_v6  ;;  %327 = vmatprep.subr.bf16.mxu1 %v1921_v0  ;;  %v1828_v20 = vld [vmem:[%s2472_s0 + $0xb0] sm:$0xff]   ;;  %v1831_v24 = vld [vmem:[%s2472_s0 + $0xb8] sm:$0xff]   ;;  %v1836_v29 = vld [vmem:[%s2472_s0 + $0xc0] sm:$0xff]  }
   0x9   :  { %1698 = vmatprep.subr.bf16.mxu0 %v1815_v7  ;;  %v1829_v21 = vld [vmem:[%s2472_s0 + $0x30] sm:$0xff]   ;;  %v2039_v25 = vld [vmem:[%s2473_s1 + $0xc] ss:$16 sps:$4 sm:$0xff]   ;;  %v2068_v32 = vld [vmem:[%s2473_s1 + $0x8] ss:$16 sps:$4 sm:$0xff]  }
   0xa   :  { %v2027_v22 = vld [vmem:[%s2473_s1 + $0x4] ss:$16 sps:$4 sm:$0xff]   ;;  %v1832_v26 = vld [vmem:[%s2472_s0 + $0x38] sm:$0xff]   ;;  %1442 = vmatprep.mubr.msk.bf16.mxu1 %vm267_vm0, %v2039_v25  ;;  %v2053_v28 = vld [vmem:[%s2473_s1] ss:$16 sps:$4 sm:$0xff]  }
   0xb   :  { %328 = vmatpush1.bf16.msra.mxu1 %v1816_v8  ;;  %306 = vmatprep.mubr.bf16.mxu0 %v2027_v22  ;;  %v1842_v30 = vld [vmem:[%s2472_s0 + $0xc8] sm:$0xff]   ;;  %v1843_v31 = vld [vmem:[%s2472_s0 + $0x110] sm:$0xff]   ;;  %v1846_v35 = vld [vmem:[%s2472_s0 + $0x118] sm:$0xff]  }
   0xc   :  { %1699 = vmatpush3.bf16.msra.mxu0 %v1817_v9  ;;  %329 = vmatprep.subr.bf16.mxu1 %v1921_v0  ;;  %v1841_v33 = vld [vmem:[%s2472_s0 + $0x148] sm:$0xff]   ;;  %v1845_v34 = vld [vmem:[%s2472_s0 + $0xd0] sm:$0xff]   ;;  %v1848_v37 = vld [vmem:[%s2472_s0 + $0xd8] sm:$0xff]  }
   0xd   :  { %1700 = vmatprep.subr.bf16.mxu0 %v1818_v10  ;;  %v1844_v36 = vld [vmem:[%s2472_s0 + $0x150] sm:$0xff]   ;;  %v1849_v38 = vld [vmem:[%s2472_s0 + $0x120] sm:$0xff]   ;;  %v1847_v39 = vld [vmem:[%s2472_s0 + $0x158] sm:$0xff]  }
   0xe   :  { %v1851_v40 = vld [vmem:[%s2472_s0 + $0xe0] sm:$0xff]   ;;  %v1852_v42 = vld [vmem:[%s2472_s0 + $0x128] sm:$0xff]   ;;  %v1855_v47 = vld [vmem:[%s2472_s0 + $0x130] sm:$0xff]  }
   0xf   :  { %330 = vmatpush1.bf16.msra.mxu1 %v1819_v11  ;;  %v1850_v41 = vld [vmem:[%s2472_s0 + $0x160] sm:$0xff]   ;;  %v2118_v45 = vld [vmem:[%s2473_s1 + $0x2c] ss:$16 sps:$4 sm:$0xff]   ;;  %v2134_v48 = vld [vmem:[%s2473_s1 + $0x28] ss:$16 sps:$4 sm:$0xff]  }
  0x10   :  { %1701 = vmatpush3.bf16.msra.mxu0 %v1820_v12  ;;  %331 = vmatprep.subr.bf16.mxu1 %v1921_v0  ;;  %v2108_v43 = vld [vmem:[%s2473_s1 + $0x24] ss:$16 sps:$4 sm:$0xff]   ;;  %v2113_v44 = vld [vmem:[%s2473_s1 + $0x20] ss:$16 sps:$4 sm:$0xff]   ;;  %v1854_v46 = vld [vmem:[%s2472_s0 + $0xe8] sm:$0xff]  }
  0x11   :  { %1702 = vmatprep.subr.bf16.mxu0 %v1821_v13  ;;  %v1853_v49 = vld [vmem:[%s2472_s0 + $0x168] sm:$0xff]   ;;  %v1857_v50 = vld [vmem:[%s2472_s0 + $0xf0] sm:$0xff]   ;;  %v1863_v51 = vld [vmem:[%s2472_s0 + $0x138] sm:$0xff]  }
  0x12   :  { %v1856_v52 = vld [vmem:[%s2472_s0 + $0x170] sm:$0xff]   ;;  %v1866_v53 = vld [vmem:[%s2472_s0 + $0xf8] sm:$0xff]   ;;  %v1867_v54 = vld [vmem:[%s2472_s0 + $0x140] sm:$0xff]  }
  0x13   :  { %332 = vmatpush1.bf16.msra.mxu1 %v1822_v14  ;;  %v1864_v55 = vld [vmem:[%s2472_s0 + $0x178] sm:$0xff]   ;;  %v1869_v56 = vld [vmem:[%s2472_s0 + $0x100] sm:$0xff]   ;;  %v1871_v57 = vld [vmem:[%s2472_s0 + $0x1d0] sm:$0xff]  }
  0x14   :  { %1703 = vmatpush3.bf16.msra.mxu0 %v1823_v15  ;;  %333 = vmatprep.subr.bf16.mxu1 %v1921_v0  ;;  %v1868_v58 = vld [vmem:[%s2472_s0 + $0x180] sm:$0xff]   ;;  %v1873_v59 = vld [vmem:[%s2472_s0 + $0x190] sm:$0xff]   ;;  %v1874_v60 = vld [vmem:[%s2472_s0 + $0x1d8] sm:$0xff]  }
  0x15   :  { %1704 = vmatprep.subr.bf16.mxu0 %v1824_v16  ;;  %v1870_v61 = vld [vmem:[%s2472_s0 + $0x188] sm:$0xff]   ;;  %v1876_v62 = vld [vmem:[%s2472_s0 + $0x198] sm:$0xff]   ;;  %v1877_v63 = vld [vmem:[%s2472_s0 + $0x1e0] sm:$0xff]  }
  0x16   :  { %v1872_v1 = vld [vmem:[%s2472_s0 + $0x210] sm:$0xff]   ;;  %v1879_v2 = vld [vmem:[%s2472_s0 + $0x1a0] sm:$0xff]   ;;  %v1880_v3 = vld [vmem:[%s2472_s0 + $0x1e8] sm:$0xff]  }
  0x17   :  { %334 = vmatpush1.bf16.msra.mxu1 %v1825_v17  ;;  %v1875_v4 = vld [vmem:[%s2472_s0 + $0x218] sm:$0xff]   ;;  %v1882_v5 = vld [vmem:[%s2472_s0 + $0x1a8] sm:$0xff]   ;;  %v1883_v6 = vld [vmem:[%s2472_s0 + $0x1f0] sm:$0xff]  }
  0x18   :  { %1705 = vmatpush3.bf16.msra.mxu0 %v1826_v18  ;;  %335 = vmatprep.subr.bf16.mxu1 %v1921_v0  ;;  %v1878_v7 = vld [vmem:[%s2472_s0 + $0x220] sm:$0xff]   ;;  %v1885_v8 = vld [vmem:[%s2472_s0 + $0x1b0] sm:$0xff]   ;;  %v1886_v9 = vld [vmem:[%s2472_s0 + $0x1f8] sm:$0xff]  }
  0x19   :  { %1706 = vmatprep.subr.bf16.mxu0 %v1827_v19  ;;  %v1881_v10 = vld [vmem:[%s2472_s0 + $0x228] sm:$0xff]   ;;  %v1888_v11 = vld [vmem:[%s2472_s0 + $0x1b8] sm:$0xff]   ;;  %v1889_v12 = vld [vmem:[%s2472_s0 + $0x200] sm:$0xff]  }
  0x1a   :  { %v1884_v13 = vld [vmem:[%s2472_s0 + $0x230] sm:$0xff]   ;;  %v1891_v14 = vld [vmem:[%s2472_s0 + $0x1c0] sm:$0xff]   ;;  %v1892_v15 = vld [vmem:[%s2472_s0 + $0x208] sm:$0xff]  }
  0x1b   :  { %336 = vmatpush1.bf16.msra.mxu1 %v1828_v20  ;;  %v1887_v16 = vld [vmem:[%s2472_s0 + $0x238] sm:$0xff]   ;;  %v1894_v17 = vld [vmem:[%s2472_s0 + $0x1c8] sm:$0xff]   ;;  %v1890_v19 = vld [vmem:[%s2472_s0 + $0x240] sm:$0xff]  }
  0x1c   :  { %1707 = vmatpush3.bf16.msra.mxu0 %v1829_v21  ;;  %337 = vmatprep.subr.bf16.mxu1 %v1921_v0  ;;  %v1896_v18 = vld [vmem:[%s2472_s0 + $0x298] sm:$0xff]   ;;  %v1899_v21 = vld [vmem:[%s2472_s0 + $0x2a0] sm:$0xff]  }
  0x1d   :  { %1708 = vmatprep.subr.bf16.mxu0 %v1830_v23  ;;  %v1897_v20 = vld [vmem:[%s2472_s0 + $0x258] sm:$0xff]   ;;  %v1893_v23 = vld [vmem:[%s2472_s0 + $0x248] sm:$0xff]  }
  0x1f   :  { %338 = vmatpush1.bf16.msra.mxu1 %v1831_v24  ;;  %v1900_v24 = vld [vmem:[%s2472_s0 + $0x260] sm:$0xff]  }
  0x20   :  { %1709 = vmatpush3.bf16.msra.mxu0 %v1832_v26  ;;  %339 = vmatprep.subr.bf16.mxu1 %v1921_v0  ;;  %v1902_v26 = vld [vmem:[%s2472_s0 + $0x2a8] sm:$0xff]  }
  0x21   :  { %1722 = vmatprep.subr.bf16.mxu0 %v1840_v27  ;;  %v1895_v27 = vld [vmem:[%s2472_s0 + $0x250] sm:$0xff]  }
  0x23   :  { %307 = vmatmul.mubr.bf16.vlgmr.msra.gmra.mrb[0].mxu0 %v2053_v28  ;;  %340 = vmatpush1.bf16.msra.mxu1 %v1836_v29  ;;  %v1903_v29 = vld [vmem:[%s2472_s0 + $0x268] sm:$0xff]  }
  0x24   :  { %622 = vmatprep.subr.bf16.mxu1 %v1921_v0  ;;  %1723 = vmatpush3.bf16.msra.mxu0 %v1842_v30  ;;  %v1295_v30 = vld [vmem:[%s2474_s2 + $0x10] sm:$0xff] }
  0x25   :  { %1724 = vmatprep.subr.bf16.mxu0 %v1843_v31  ;;  %314 = vmatprep.mubr.bf16.mxu0 %v2108_v43  ;;  %v1293_v31 = vld [vmem:[%s2474_s2] sm:$0xff] }
  0x26   :  { %356 = vmatmul.mubr.bf16.vlgmr.msra.gmra.mrb[0].mxu1 %v2068_v32  ;;  %1309 = vperm.xlu1 %1808, %v1295_v30  }
  0x27   :  { %623 = vmatpush1.bf16.msra.mxu1 %v1841_v33  ;;  %1443 = vmatprep.mubr.msk.bf16.mxu1 %vm267_vm0, %v2118_v45  ;;  %v1905_v33 = vld [vmem:[%s2472_s0 + $0x2b0] sm:$0xff]  }
  0x28   :  { %624 = vmatprep.subr.bf16.mxu1 %v1921_v0  ;;  %1725 = vmatpush3.bf16.msra.mxu0 %v1845_v34  ;;  %v1898_v34 = vld [vmem:[%s2472_s0 + $0x2d8] sm:$0xff]  }
  0x29   :  { %1726 = vmatprep.subr.bf16.mxu0 %v1846_v35  ;;  %1299 = vperm.xlu0 %1807, %v1293_v31   ;;  %v1906_v35 = vld [vmem:[%s2472_s0 + $0x270] sm:$0xff]  }
  0x2b   :  { %625 = vmatpush1.bf16.msra.mxu1 %v1844_v36  ;;  %315 = vmatmul.mubr.bf16.gmra.mrb[4].mxu0 %v2113_v44  ;;  %v1296_v36 = vld [vmem:[%s2474_s2 + $0x18] sm:$0xff] }
  0x2c   :  { %626 = vmatprep.subr.bf16.mxu1 %v1921_v0  ;;  %1727 = vmatpush3.bf16.msra.mxu0 %v1848_v37  ;;  %v1908_v37 = vld [vmem:[%s2472_s0 + $0x2b8] sm:$0xff]  }
  0x2d   :  { %1728 = vmatprep.subr.bf16.mxu0 %v1849_v38  ;;  %605 = vmatprep.mubr.bf16.mxu0 %v2027_v22  ;;  %v1294_v38 = vld [vmem:[%s2474_s2 + $0x8] sm:$0xff] }
  0x2e   :  { %364 = vmatmul.mubr.bf16.gmra.mrb[4].mxu1 %v2134_v48  ;;  %1314 = vperm.xlu1 %1808, %v1296_v36  }
  0x2f   :  { %627 = vmatpush1.bf16.msra.mxu1 %v1847_v39  ;;  %1519 = vmatprep.mubr.msk.bf16.mxu1 %vm267_vm0, %v2039_v25  ;;  %v1909_v39 = vld [vmem:[%s2472_s0 + $0x278] sm:$0xff]  }
  0x30   :  { %628 = vmatprep.subr.bf16.mxu1 %v1921_v0  ;;  %1729 = vmatpush3.bf16.msra.mxu0 %v1851_v40  ;;  %v1322_v40 = vld [vmem:[%s2475_s3 + $0x8] sm:$0xff] }
  0x31   :  { %1730 = vmatprep.subr.bf16.mxu0 %v1852_v42  ;;  %1304 = vperm.xlu0 %1807, %v1294_v38   ;;  %v1321_v42 = vld [vmem:[%s2475_s3] sm:$0xff] }
  0x32   :  { %1332 = vperm.xlu1 %1808, %v1322_v40  }
  0x33   :  { %629 = vmatpush1.bf16.msra.mxu1 %v1850_v41  ;;  %v1911_v41 = vld [vmem:[%s2472_s0 + $0x2c0] sm:$0xff]  }
  0x34   :  { %630 = vmatprep.subr.bf16.mxu1 %v1921_v0  ;;  %1731 = vmatpush3.bf16.msra.mxu0 %v1854_v46  ;;  %v1904_v46 = vld [vmem:[%s2472_s0 + $0x2e8] sm:$0xff]  }
  0x35   :  { %1732 = vmatprep.subr.bf16.mxu0 %v1855_v47  ;;  %v1912_v47 = vld [vmem:[%s2472_s0 + $0x280] sm:$0xff]   ;;  %1327 = vperm.xlu0 %1807, %v1321_v42  }
  0x37   :  { %631 = vmatpush1.bf16.msra.mxu1 %v1853_v49  ;;  %v1324_v49 = vld [vmem:[%s2475_s3 + $0x18] sm:$0xff] }
  0x38   :  { %632 = vmatprep.subr.bf16.mxu1 %v1921_v0  ;;  %1733 = vmatpush3.bf16.msra.mxu0 %v1857_v50  ;;  %v1914_v50 = vld [vmem:[%s2472_s0 + $0x2c8] sm:$0xff]  }
  0x39   :  { %1734 = vmatprep.subr.bf16.mxu0 %v1863_v51  ;;  %v1323_v51 = vld [vmem:[%s2475_s3 + $0x10] sm:$0xff]  ;;  %1342 = vperm.xlu1 %1808, %v1324_v49  }
  0x3a   :  { %1337 = vperm.xlu0 %1807, %v1323_v51  }
  0x3b   :  { %633 = vmatpush1.bf16.msra.mxu1 %v1856_v52  ;;  %v1907_v52 = vld [vmem:[%s2472_s0 + $0x2f0] sm:$0xff]  }
  0x3c   :  { %634 = vmatprep.subr.bf16.mxu1 %v1921_v0  ;;  %1735 = vmatpush3.bf16.msra.mxu0 %v1866_v53  ;;  %v1915_v53 = vld [vmem:[%s2472_s0 + $0x288] sm:$0xff]  }
  0x3d   :  { %1736 = vmatprep.subr.bf16.mxu0 %v1867_v54  ;;  %v1354_v54 = vld [vmem:[%s2476_s4 + $0x8] sm:$0xff] }
  0x3e   :  { %1364 = vperm.xlu1 %1808, %v1354_v54  }
  0x3f   :  { %635 = vmatpush1.bf16.msra.mxu1 %v1864_v55  ;;  %v1917_v55 = vld [vmem:[%s2472_s0 + $0x2d0] sm:$0xff]  }
  0x40   :  { %636 = vmatprep.subr.bf16.mxu1 %v1921_v0  ;;  %1737 = vmatpush3.bf16.msra.mxu0 %v1869_v56  ;;  %v1910_v56 = vld [vmem:[%s2472_s0 + $0x2f8] sm:$0xff]  }
  0x41   :  { %1750 = vmatprep.subr.bf16.mxu0 %v1871_v57  ;;  %v1918_v57 = vld [vmem:[%s2472_s0 + $0x290] sm:$0xff]  }
  0x43   :  { %637 = vmatpush1.bf16.msra.mxu1 %v1868_v58  ;;  %606 = vmatmul.mubr.bf16.vlgmr.msra.gmra.mrb[8].mxu0 %v2053_v28  ;;  %v1356_v58 = vld [vmem:[%s2476_s4 + $0x18] sm:$0xff] }
  0x44   :  { %638 = vmatprep.subr.bf16.mxu1 %v1921_v0  ;;  %1751 = vmatpush3.bf16.msra.mxu0 %v1873_v59  ;;  %v1355_v59 = vld [vmem:[%s2476_s4 + $0x10] sm:$0xff] }
  0x45   :  { %613 = vmatprep.mubr.bf16.mxu0 %v2108_v43  ;;  %1752 = vmatprep.subr.bf16.mxu0 %v1874_v60  ;;  %v1913_v60 = vld [vmem:[%s2472_s0 + $0x300] sm:$0xff]  }
  0x46   :  { %1374 = vperm.xlu1 %1808, %v1356_v58  }
  0x47   :  { %639 = vmatpush1.bf16.msra.mxu1 %v1870_v61  ;;  %v1916_v61 = vld [vmem:[%s2472_s0 + $0x308] sm:$0xff]  }
  0x48   :  { %921 = vmatprep.subr.bf16.mxu1 %v1921_v0  ;;  %1753 = vmatpush3.bf16.msra.mxu0 %v1876_v62  ;;  %v1919_v62 = vld [vmem:[%s2472_s0 + $0x310] sm:$0xff]  }
  0x49   :  { %1754 = vmatprep.subr.bf16.mxu0 %v1877_v63  ;;  %v1920_v63 = vld [vmem:[%s2472_s0 + $0x318] sm:$0xff]  }
  0x4a   :  { %655 = vmatmul.mubr.bf16.vlgmr.msra.gmra.mrb[8].mxu1 %v2068_v32 }
  0x4b   :  { %922 = vmatpush1.bf16.msra.mxu1 %v1872_v1  ;;  %614 = vmatmul.mubr.bf16.gmra.mrb[12].mxu0 %v2113_v44 }
  0x4c   :  { %923 = vmatprep.subr.bf16.mxu1 %v1921_v0  ;;  %1520 = vmatprep.mubr.msk.bf16.mxu1 %vm267_vm0, %v2118_v45 }
  0x4d   :  { %1755 = vmatpush3.bf16.msra.mxu0 %v1879_v2  ;;  %904 = vmatprep.mubr.bf16.mxu0 %v2027_v22 }
  0x4e   :  { %1756 = vmatprep.subr.bf16.mxu0 %v1880_v3 }
  0x4f   :  { %924 = vmatpush1.bf16.msra.mxu1 %v1875_v4 }
  0x50   :  { %925 = vmatprep.subr.bf16.mxu1 %v1921_v0 }
  0x51   :  { %1757 = vmatpush3.bf16.msra.mxu0 %v1882_v5 }
  0x52   :  { %663 = vmatmul.mubr.bf16.gmra.mrb[12].mxu1 %v2134_v48  ;;  %1758 = vmatprep.subr.bf16.mxu0 %v1883_v6 }
  0x53   :  { %926 = vmatpush1.bf16.msra.mxu1 %v1878_v7  ;;  %1596 = vmatprep.mubr.msk.bf16.mxu1 %vm267_vm0, %v2039_v25 }
  0x54   :  { %927 = vmatprep.subr.bf16.mxu1 %v1921_v0 }
  0x55   :  { %1759 = vmatpush3.bf16.msra.mxu0 %v1885_v8 }
  0x56   :  { %1760 = vmatprep.subr.bf16.mxu0 %v1886_v9 }
  0x57   :  { %928 = vmatpush1.bf16.msra.mxu1 %v1881_v10 }
  0x58   :  { %929 = vmatprep.subr.bf16.mxu1 %v1921_v0 }
  0x59   :  { %1761 = vmatpush3.bf16.msra.mxu0 %v1888_v11 }
  0x5a   :  { %1762 = vmatprep.subr.bf16.mxu0 %v1889_v12 }
  0x5b   :  { %930 = vmatpush1.bf16.msra.mxu1 %v1884_v13 }
  0x5c   :  { %931 = vmatprep.subr.bf16.mxu1 %v1921_v0 }
  0x5d   :  { %1763 = vmatpush3.bf16.msra.mxu0 %v1891_v14 }
  0x5e   :  { %1764 = vmatprep.subr.bf16.mxu0 %v1892_v15 }
  0x5f   :  { %932 = vmatpush1.bf16.msra.mxu1 %v1887_v16 }
  0x60   :  { %933 = vmatprep.subr.bf16.mxu1 %v1921_v0 }
  0x61   :  { %1765 = vmatpush3.bf16.msra.mxu0 %v1894_v17 }
  0x62   :  { %1778 = vmatprep.subr.bf16.mxu0 %v1896_v18 }
  0x63   :  { %934 = vmatpush1.bf16.msra.mxu1 %v1890_v19 }
  0x64   :  { %935 = vmatprep.subr.bf16.mxu1 %v1921_v0  ;;  %905 = vmatmul.mubr.bf16.vlgmr.msra.gmra.mrb[16].mxu0 %v2053_v28 }
  0x65   :  { %1779 = vmatpush3.bf16.msra.mxu0 %v1897_v20  ;;  %912 = vmatprep.mubr.bf16.mxu0 %v2108_v43 }
  0x66   :  { %1780 = vmatprep.subr.bf16.mxu0 %v1899_v21 }
  0x67   :  { %936 = vmatpush1.bf16.msra.mxu1 %v1893_v23 }
  0x68   :  { %937 = vmatprep.subr.bf16.mxu1 %v1921_v0 }
  0x69   :  { %1781 = vmatpush3.bf16.msra.mxu0 %v1900_v24 }
  0x6a   :  { %1782 = vmatprep.subr.bf16.mxu0 %v1902_v26 }
  0x6b   :  { %938 = vmatpush1.bf16.msra.mxu1 %v1895_v27 }
  0x6c   :  { %1220 = vmatprep.subr.bf16.mxu1 %v1921_v0  ;;  %913 = vmatmul.mubr.bf16.gmra.mrb[20].mxu0 %v2113_v44 }
  0x6d   :  { %1783 = vmatpush3.bf16.msra.mxu0 %v1903_v29  ;;  %1203 = vmatprep.mubr.bf16.mxu0 %v2027_v22  ;;  %v1901_v22 = vld [vmem:[%s2472_s0 + $0x2e0] sm:$0xff]  }
  0x6e   :  { %954 = vmatmul.mubr.bf16.vlgmr.msra.gmra.mrb[16].mxu1 %v2068_v32  ;;  %1784 = vmatprep.subr.bf16.mxu0 %v1905_v33 }
  0x6f   :  { %1221 = vmatpush1.bf16.msra.mxu1 %v1898_v34  ;;  %1597 = vmatprep.mubr.msk.bf16.mxu1 %vm267_vm0, %v2118_v45 }
  0x70   :  { %1222 = vmatprep.subr.bf16.mxu1 %v1921_v0 }
  0x71   :  { %1785 = vmatpush3.bf16.msra.mxu0 %v1906_v35 }
  0x72   :  { %1786 = vmatprep.subr.bf16.mxu0 %v1908_v37 }
  0x73   :  { %1223 = vmatpush1.bf16.msra.mxu1 %v1901_v22 }
  0x74   :  { %1224 = vmatprep.subr.bf16.mxu1 %v1921_v0 }
  0x75   :  { %1787 = vmatpush3.bf16.msra.mxu0 %v1909_v39 }
  0x76   :  { %1788 = vmatprep.subr.bf16.mxu0 %v1911_v41  ;;  %962 = vmatmul.mubr.bf16.gmra.mrb[20].mxu1 %v2134_v48 }
  0x77   :  { %1225 = vmatpush1.bf16.msra.mxu1 %v1904_v46  ;;  %1673 = vmatprep.mubr.msk.bf16.mxu1 %vm267_vm0, %v2039_v25  ;;  %v1353_v25 = vld [vmem:[%s2476_s4] sm:$0xff] }
  0x78   :  { %1226 = vmatprep.subr.bf16.mxu1 %v1921_v0  ;;  %1359 = vperm.xlu0 %1807, %v1353_v25  }
  0x79   :  { %1789 = vmatpush3.bf16.msra.mxu0 %v1912_v47 }
  0x7a   :  { %1790 = vmatprep.subr.bf16.mxu0 %v1914_v50 }
  0x7b   :  { %1227 = vmatpush1.bf16.msra.mxu1 %v1907_v52 }
  0x7c   :  { %1228 = vmatprep.subr.bf16.mxu1 %v1921_v0  ;;  %1369 = vperm.xlu0 %1807, %v1355_v59  }
  0x7d   :  { %1791 = vmatpush3.bf16.msra.mxu0 %v1915_v53 }
  0x7e   :  { %1792 = vmatprep.subr.bf16.mxu0 %v1917_v55 }
  0x7f   :  { %1229 = vmatpush1.bf16.msra.mxu1 %v1910_v56 }
  0x80   :  { %1230 = vmatprep.subr.bf16.mxu1 %v1921_v0 }
  0x81   :  { %1793 = vmatpush3.bf16.msra.mxu0 %v1918_v57 }
  0x83   :  { %1231 = vmatpush1.bf16.msra.mxu1 %v1913_v60 }
  0x84   :  { %1232 = vmatprep.subr.bf16.mxu1 %v1921_v0  ;;  %1204 = vmatmul.mubr.bf16.vlgmr.msra.gmra.mrb[24].mxu0 %v2053_v28 }
  0x85   :  { %1211 = vmatprep.mubr.bf16.mxu0 %v2108_v43 }
  0x87   :  { %1233 = vmatpush1.bf16.msra.mxu1 %v1916_v61 }
  0x88   :  { %1234 = vmatprep.subr.bf16.mxu1 %v1921_v0 }
  0x8b   :  { %1235 = vmatpush1.bf16.msra.mxu1 %v1919_v62 }
  0x8c   :  { %1236 = vmatprep.subr.bf16.mxu1 %v1921_v0  ;;  %1212 = vmatmul.mubr.bf16.gmra.mrb[28].mxu0 %v2113_v44 }
  0x8f   :  { %1237 = vmatpush1.bf16.msra.mxu1 %v1920_v63 }
  0x92   :  { %1253 = vmatmul.mubr.bf16.vlgmr.msra.gmra.mrb[24].mxu1 %v2068_v32 }
  0x93   :  { %1674 = vmatprep.mubr.msk.bf16.mxu1 %vm267_vm0, %v2118_v45 }
  0x9a   :  { %1261 = vmatmul.mubr.bf16.gmra.mrb[28].mxu1 %v2134_v48 }
  0xf6   :  { %v1710_v28 = vpop.f32.mrb[0].mxu0 }
  0xf7   :  { %v1711_v43 = vpop.f32.mrb[1].mxu0 }
  0xf8   :  { %v1712_v1 = vadd.f32 %v1711_v43, %v1710_v28  ;;  %v1713_v2 = vpop.f32.mrb[2].mxu0 }
  0xf9   :  { %v1714_v3 = vpop.f32.mrb[3].mxu0  ;;  %v357_v4 = vpop.f32.mrb[0].mxu1 }
  0xfa   :  { %v1715_v5 = vadd.f32 %v1714_v3, %v1713_v2  ;;  %v2406_v6 = vadd.f32 %v1712_v1, %v357_v4  ;;  %v359_v0 = vpop.f32.mrb[1].mxu1 }
  0xfb   :  { %v360_v7 = vpop.f32.mrb[2].mxu1 }
  0xfc   :  { %v2408_v44 = vadd.f32 %v1715_v5, %v360_v7  ;;  %v362_v8 = vpop.f32.mrb[3].mxu1 }
  0xfe   :  { %v1716_v32 = vpop.f32.mrb[4].mxu0 }
  0xff   :  { %v1717_v9 = vpop.f32.mrb[5].mxu0 }
 0x100   :  { %v1718_v10 = vadd.f32 %v1717_v9, %v1716_v32  ;;  %v1719_v45 = vpop.f32.mrb[6].mxu0 }
 0x101   :  { %v365_v11 = vpop.f32.mrb[4].mxu1  ;;  %v1720_v48 = vpop.f32.mrb[7].mxu0 }
 0x102   :  { %v2410_v12 = vadd.f32 %v1718_v10, %v365_v11  ;;  %v1721_v13 = vadd.f32 %v1720_v48, %v1719_v45  ;;  %v367_v14 = vpop.f32.mrb[5].mxu1 }
 0x103   :  { %v368_v15 = vpop.f32.mrb[6].mxu1 }
 0x104   :  { %v2412_v16 = vadd.f32 %v1721_v13, %v368_v15  ;;  %v370_v17 = vpop.f32.mrb[7].mxu1  ;;  %v1300_v13 = vpop.permute.xlu0 %1299 }
 0x105   :  { %v1310_v17 = vpop.permute.xlu1 %1309 }
 0x116   :  { %v1738_v18 = vpop.f32.mrb[8].mxu0 }
 0x117   :  { %v1739_v19 = vpop.f32.mrb[9].mxu0 }
 0x118   :  { %v1740_v20 = vadd.f32 %v1739_v19, %v1738_v18  ;;  %v1741_v21 = vpop.f32.mrb[10].mxu0 }
 0x119   :  { %v1742_v23 = vpop.f32.mrb[11].mxu0 }
 0x11a   :  { %v1743_v24 = vadd.f32 %v1742_v23, %v1741_v21  ;;  %v1305_v23 = vpop.permute.xlu0 %1304 }
 0x11d   :  { %v656_v26 = vpop.f32.mrb[8].mxu1 }
 0x11e   :  { %v2414_v27 = vadd.f32 %v1740_v20, %v656_v26  ;;  %v658_v29 = vpop.f32.mrb[9].mxu1  ;;  %v1744_v30 = vpop.f32.mrb[12].mxu0 }
 0x11f   :  { %v659_v31 = vpop.f32.mrb[10].mxu1  ;;  %v1745_v33 = vpop.f32.mrb[13].mxu0 }
 0x120   :  { %v1269_v34 = vmax.f32 %v2406_v6, %v2414_v27  ;;  %v1281_v35 = vmin.f32 %v2406_v6, %v2414_v27  ;;  %v2420_v36 = vadd.f32 %v1743_v24, %v659_v31  ;;  %v661_v37 = vpop.f32.mrb[11].mxu1  ;;  %v1746_v38 = vadd.f32 %v1745_v33, %v1744_v30  ;;  %v1747_v22 = vpop.f32.mrb[14].mxu0 }
 0x121   :  { %v1748_v39 = vpop.f32.mrb[15].mxu0  ;;  %v1315_v24 = vpop.permute.xlu1 %1314 }
 0x122   :  { %v1270_v40 = vmax.f32 %v2408_v44, %v2420_v36  ;;  %v1282_v41 = vmin.f32 %v2408_v44, %v2420_v36  ;;  %v1749_v42 = vadd.f32 %v1748_v39, %v1747_v22  ;;  %v1328_v37 = vpop.permute.xlu0 %1327 }
 0x125   :  { %v664_v46 = vpop.f32.mrb[12].mxu1  ;;  %v1333_v22 = vpop.permute.xlu1 %1332 }
 0x126   :  { %v2426_v47 = vadd.f32 %v1746_v38, %v664_v46  ;;  %v666_v49 = vpop.f32.mrb[13].mxu1 }
 0x127   :  { %v667_v50 = vpop.f32.mrb[14].mxu1 }
 0x128   :  { %v1271_v51 = vmax.f32 %v2410_v12, %v2426_v47  ;;  %v1283_v52 = vmin.f32 %v2410_v12, %v2426_v47  ;;  %v2432_v53 = vadd.f32 %v1749_v42, %v667_v50  ;;  %v669_v54 = vpop.f32.mrb[15].mxu1 }
 0x12a   :  { %v1272_v55 = vmax.f32 %v2412_v16, %v2432_v53  ;;  %v1284_v25 = vmin.f32 %v2412_v16, %v2432_v53 }
 0x137   :  { %v1766_v56 = vpop.f32.mrb[16].mxu0 }
 0x138   :  { %v1767_v57 = vpop.f32.mrb[17].mxu0 }
 0x139   :  { %v1768_v58 = vadd.f32 %v1767_v57, %v1766_v56  ;;  %v1769_v59 = vpop.f32.mrb[18].mxu0 }
 0x13a   :  { %v1770_v60 = vpop.f32.mrb[19].mxu0 }
 0x13b   :  { %v1771_v61 = vadd.f32 %v1770_v60, %v1769_v59 }
 0x13f   :  { %v1772_v62 = vpop.f32.mrb[20].mxu0 }
 0x140   :  { %v1773_v63 = vpop.f32.mrb[21].mxu0 }
 0x141   :  { %v955_v28 = vpop.f32.mrb[16].mxu1  ;;  %v1774_v43 = vadd.f32 %v1773_v63, %v1772_v62  ;;  %v1775_v1 = vpop.f32.mrb[22].mxu0 }
 0x142   :  { %v956_v2 = vadd.f32 %v1768_v58, %v955_v28  ;;  %v957_v3 = vpop.f32.mrb[17].mxu1  ;;  %v1776_v4 = vpop.f32.mrb[23].mxu0 }
 0x143   :  { %v958_v5 = vpop.f32.mrb[18].mxu1  ;;  %v1777_v0 = vadd.f32 %v1776_v4, %v1775_v1  ;;  %v1338_v58 = vpop.permute.xlu0 %1337 }
 0x144   :  { %v959_v7 = vadd.f32 %v1771_v61, %v958_v5  ;;  %v960_v8 = vpop.f32.mrb[19].mxu1  ;;  %v1343_v63 = vpop.permute.xlu1 %1342 }
 0x147   :  { %v1360_v27 = vpop.permute.xlu0 %1359 }
 0x149   :  { %v963_v32 = vpop.f32.mrb[20].mxu1 }
 0x14a   :  { %v964_v9 = vadd.f32 %v1774_v43, %v963_v32  ;;  %v965_v10 = vpop.f32.mrb[21].mxu1 }
 0x14b   :  { %v966_v45 = vpop.f32.mrb[22].mxu1 }
 0x14c   :  { %v2438_v11 = vadd.f32 %v1777_v0, %v966_v45  ;;  %v968_v48 = vpop.f32.mrb[23].mxu1 }
 0x14d   :  { %v1365_v48 = vpop.permute.xlu1 %1364 }
 0x157   :  { %v1794_v14 = vpop.f32.mrb[24].mxu0 }
 0x158   :  { %v1795_v15 = vpop.f32.mrb[25].mxu0 }
 0x159   :  { %v1796_v18 = vadd.f32 %v1795_v15, %v1794_v14  ;;  %v1797_v19 = vpop.f32.mrb[26].mxu0 }
 0x15a   :  { %v1798_v20 = vpop.f32.mrb[27].mxu0 }
 0x15b   :  { %v1799_v21 = vadd.f32 %v1798_v20, %v1797_v19 }
 0x15f   :  { %v1800_v26 = vpop.f32.mrb[28].mxu0 }
 0x160   :  { %v1801_v29 = vpop.f32.mrb[29].mxu0 }
 0x161   :  { %v1802_v30 = vadd.f32 %v1801_v29, %v1800_v26  ;;  %v1803_v31 = vpop.f32.mrb[30].mxu0  ;;  %v1375_v26 = vpop.permute.xlu1 %1374 }
 0x162   :  { %v1804_v33 = vpop.f32.mrb[31].mxu0 }
 0x163   :  { %v1805_v38 = vadd.f32 %v1804_v33, %v1803_v31 }
 0x165   :  { %v1254_v39 = vpop.f32.mrb[24].mxu1 }
 0x166   :  { %v1255_v42 = vadd.f32 %v1796_v18, %v1254_v39  ;;  %v1256_v46 = vpop.f32.mrb[25].mxu1 }
 0x167   :  { %v1257_v49 = vpop.f32.mrb[26].mxu1 }
 0x168   :  { %v1273_v50 = vmax.f32 %v956_v2, %v1255_v42  ;;  %v1285_v54 = vmin.f32 %v956_v2, %v1255_v42  ;;  %v1258_v56 = vadd.f32 %v1799_v21, %v1257_v49  ;;  %v1259_v57 = vpop.f32.mrb[27].mxu1 }
 0x16a   :  { %v1277_v59 = vmax.f32 %v1269_v34, %v1273_v50  ;;  %v1289_v60 = vmin.f32 %v1281_v35, %v1285_v54  ;;  %v1274_v61 = vmax.f32 %v959_v7, %v1258_v56  ;;  %v1286_v62 = vmin.f32 %v959_v7, %v1258_v56 }
 0x16c   :  { %v1317_v28 = vmul.f32 %v1300_v13, %v1277_v59  ;;  %v1345_v43 = vmul.f32 %v1328_v37, %v1289_v60  ;;  %v1278_v1 = vmax.f32 %v1270_v40, %v1274_v61  ;;  %v1290_v2 = vmin.f32 %v1282_v41, %v1286_v62 }
 0x16d   :  { %v1262_v3 = vpop.f32.mrb[28].mxu1 }
 0x16e   :  { %v1349_v4 = vadd.f32 %v1345_v43, %v1317_v28  ;;  %v1318_v34 = vmul.f32 %v1305_v23, %v1278_v1  ;;  %v1346_v5 = vmul.f32 %v1333_v22, %v1290_v2  ;;  %v1263_v0 = vadd.f32 %v1802_v30, %v1262_v3  ;;  %v1264_v6 = vpop.f32.mrb[29].mxu1 }
 0x16f   :  { %v1265_v35 = vpop.f32.mrb[30].mxu1 }
 0x170   :  { %v1377_v7 = vadd.f32 %v1360_v27, %v1349_v4  ;;  %v1350_v8 = vadd.f32 %v1346_v5, %v1318_v34  ;;  %v1275_v32 = vmax.f32 %v964_v9, %v1263_v0  ;;  %v1287_v10 = vmin.f32 %v964_v9, %v1263_v0  ;;  %v1267_v45 = vpop.f32.mrb[31].mxu1 }
 0x171   :  { %v1266_v13 = vadd.f32 %v1805_v38, %v1265_v35 }
 0x172   :  { %v1378_v40 = vadd.f32 %v1365_v48, %v1350_v8  ;;  %v1279_v44 = vmax.f32 %v1271_v51, %v1275_v32  ;;  %v1291_v36 = vmin.f32 %v1283_v52, %v1287_v10  ;;  %v1381_v15 = vmax.f32 %v1377_v7, 0.0  ;;  %v1370_v52 = vpop.permute.xlu0 %1369 }
 0x173   :  { %v1276_v41 = vmax.f32 %v2438_v11, %v1266_v13  ;;  %v1288_v14 = vmin.f32 %v2438_v11, %v1266_v13 }
 0x174   :  { %v1382_v18 = vmax.f32 %v1378_v40, 0.0  ;;  %v1319_v19 = vmul.f32 %v1310_v17, %v1279_v44  ;;  %v1347_v9 = vmul.f32 %v1338_v58, %v1291_v36 }
 0x175   :  { %v1280_v20 = vmax.f32 %v1272_v55, %v1276_v41  ;;  %v1292_v51 = vmin.f32 %v1284_v25, %v1288_v14 }
 0x176   :  { %v1686_v21 = vpack.c.bf16 %v1382_v18, %v1381_v15  ;;  %v1351_v23 = vadd.f32 %v1347_v9, %v1319_v19 }
 0x177   :  { %v1320_v12 = vmul.f32 %v1315_v24, %v1280_v20  ;;  %v1348_v47 = vmul.f32 %v1343_v63, %v1292_v51 }
 0x178   :  { %1687 = vst [vmem:[%s2477_s5] sm:$0xff] %v1686_v21   ;;  %v1379_v11 = vadd.f32 %v1370_v52, %v1351_v23 }
 0x179   :  { %v1352_v17 = vadd.f32 %v1348_v47, %v1320_v12 }
 0x17a   :  { %v1383_v30 = vmax.f32 %v1379_v11, 0.0 }
 0x17b   :  { %v1380_v29 = vadd.f32 %v1375_v26, %v1352_v17 }
 0x17d   :  { %v1384_v31 = vmax.f32 %v1380_v29, 0.0 }
 0x17f   :  { %v1691_v55 = vpack.c.bf16 %v1384_v31, %v1383_v30 }
 0x181   :  { %1693 = vst [vmem:[%s2477_s5 + $0x8] sm:$0xff] %v1691_v55  }

// kernel: net_forward.5
= control target key start
LH: loop header
LB: loop body
LE: loop exit
PB: predicated region body
PF: predicated region fallthrough
CT: control target
= control target key end

     0   :  { %vm1517_vm0 = vmmov 0   ;;  %vm858_vm1 = vcmask 261120   ;;  %s1859_s1 = inlined_call_operand.vmem [shape: bf16[1568,128], index: 1, kind: input, shape index: {}]   ;;  %s1860_s0 = inlined_call_operand.vmem [shape: bf16[8,1568], index: 0, kind: input, shape index: {}]   ;;  %s1861_s2 = inlined_call_operand.vmem [shape: f32[1,128], index: 2, kind: input, shape index: {}]   ;;  %s1862_s3 = inlined_call_operand.vmem [shape: f32[8,128], index: 3, kind: output, shape index: {}]  }
   0x1   :  { %v1405_v0 = vld [vmem:[%s1859_s1 + $0x40] sm:$0xff]   ;;  %v1409_v4 = vld [vmem:[%s1859_s1 + $0x48] sm:$0xff]   ;;  %v1413_v8 = vld [vmem:[%s1859_s1 + $0x50] sm:$0xff]  }
   0x2   :  { %v1406_v1 = vld [vmem:[%s1859_s1] sm:$0xff]   ;;  %1260 = vmatprep.subr.bf16.mxu0 %v1405_v0  ;;  %v1410_v5 = vld [vmem:[%s1859_s1 + $0x8] sm:$0xff]   ;;  %v1414_v9 = vld [vmem:[%s1859_s1 + $0x10] sm:$0xff]  }
   0x3   :  { %v1407_v2 = vld [vmem:[%s1859_s1 + $0xc0] sm:$0xff]   ;;  %1261 = vmatpush3.bf16.msra.mxu0 %v1406_v1  ;;  %v1411_v6 = vld [vmem:[%s1859_s1 + $0xc8] sm:$0xff]   ;;  %v1415_v10 = vld [vmem:[%s1859_s1 + $0xd0] sm:$0xff]  }
   0x4   :  { %v1408_v3 = vld [vmem:[%s1859_s1 + $0x80] sm:$0xff]   ;;  %1282 = vmatprep.subr.bf16.mxu1 %v1407_v2  ;;  %1262 = vmatprep.subr.bf16.mxu0 %v1409_v4  ;;  %v1412_v7 = vld [vmem:[%s1859_s1 + $0x88] sm:$0xff]   ;;  %v1416_v11 = vld [vmem:[%s1859_s1 + $0x90] sm:$0xff]  }
   0x5   :  { %1283 = vmatpush3.bf16.msra.mxu1 %v1408_v3  ;;  %v1417_v12 = vld [vmem:[%s1859_s1 + $0x58] sm:$0xff]   ;;  %v1421_v16 = vld [vmem:[%s1859_s1 + $0x60] sm:$0xff]   ;;  %v1425_v20 = vld [vmem:[%s1859_s1 + $0x68] sm:$0xff]  }
   0x6   :  { %1284 = vmatprep.subr.bf16.mxu1 %v1411_v6  ;;  %v1418_v13 = vld [vmem:[%s1859_s1 + $0x18] sm:$0xff]   ;;  %v1422_v17 = vld [vmem:[%s1859_s1 + $0x20] sm:$0xff]   ;;  %v1426_v21 = vld [vmem:[%s1859_s1 + $0x28] sm:$0xff]  }
   0x7   :  { %1263 = vmatpush3.bf16.msra.mxu0 %v1410_v5  ;;  %v1419_v14 = vld [vmem:[%s1859_s1 + $0xd8] sm:$0xff]   ;;  %v1423_v18 = vld [vmem:[%s1859_s1 + $0xe0] sm:$0xff]   ;;  %v1427_v22 = vld [vmem:[%s1859_s1 + $0xe8] sm:$0xff]  }
   0x8   :  { %1264 = vmatprep.subr.bf16.mxu0 %v1413_v8  ;;  %v1420_v15 = vld [vmem:[%s1859_s1 + $0x98] sm:$0xff]   ;;  %v1424_v19 = vld [vmem:[%s1859_s1 + $0xa0] sm:$0xff]   ;;  %v1428_v23 = vld [vmem:[%s1859_s1 + $0xa8] sm:$0xff]  }
   0x9   :  { %1285 = vmatpush3.bf16.msra.mxu1 %v1412_v7  ;;  %v1429_v24 = vld [vmem:[%s1859_s1 + $0x70] sm:$0xff]   ;;  %v1433_v28 = vld [vmem:[%s1859_s1 + $0x78] sm:$0xff]   ;;  %v15_v32 = vld [vmem:[%s1860_s0] sm:$0xff] }
   0xa   :  { %1286 = vmatprep.subr.bf16.mxu1 %v1415_v10  ;;  %v1430_v25 = vld [vmem:[%s1859_s1 + $0x30] sm:$0xff]   ;;  %v1434_v29 = vld [vmem:[%s1859_s1 + $0x38] sm:$0xff]   ;;  %v1148_v33 = vcombine.low %v15_v32, %v15_v32  ;;  %v1149_v34 = vcombine.high %v15_v32, %v15_v32  ;;  %v1439_v35 = vld [vmem:[%s1859_s1 + $0x140] sm:$0xff]  }
   0xb   :  { %1265 = vmatpush3.bf16.msra.mxu0 %v1414_v9  ;;  %v1431_v26 = vld [vmem:[%s1859_s1 + $0xf0] sm:$0xff]   ;;  %v1435_v30 = vld [vmem:[%s1859_s1 + $0xf8] sm:$0xff]   ;;  %v16_v36 = vld [vmem:[%s1860_s0 + $0x8] sm:$0xff] }
   0xc   :  { %1266 = vmatprep.subr.bf16.mxu0 %v1417_v12  ;;  %v1432_v27 = vld [vmem:[%s1859_s1 + $0xb0] sm:$0xff]   ;;  %v1436_v31 = vld [vmem:[%s1859_s1 + $0xb8] sm:$0xff]   ;;  %v1150_v37 = vcombine.low %v16_v36, %v16_v36  ;;  %v1151_v38 = vcombine.high %v16_v36, %v16_v36  ;;  %v1442_v39 = vld [vmem:[%s1859_s1 + $0x100] sm:$0xff]   ;;  %894 = vmatprep.mubr.bf16.mxu0 %v1149_v34 }
   0xd   :  { %1287 = vmatpush3.bf16.msra.mxu1 %v1416_v11  ;;  %v1443_v40 = vld [vmem:[%s1859_s1 + $0x1c0] sm:$0xff]   ;;  %v1445_v42 = vld [vmem:[%s1859_s1 + $0x148] sm:$0xff]   ;;  %v1449_v46 = vld [vmem:[%s1859_s1 + $0x150] sm:$0xff]  }
   0xe   :  { %1288 = vmatprep.subr.bf16.mxu1 %v1419_v14  ;;  %934 = vmatprep.mubr.bf16.mxu1 %v1151_v38  ;;  %v1444_v41 = vld [vmem:[%s1859_s1 + $0x180] sm:$0xff]   ;;  %v1446_v43 = vld [vmem:[%s1859_s1 + $0x108] sm:$0xff]   ;;  %v1450_v47 = vld [vmem:[%s1859_s1 + $0x110] sm:$0xff]  }
   0xf   :  { %1267 = vmatpush3.bf16.msra.mxu0 %v1418_v13  ;;  %v1447_v44 = vld [vmem:[%s1859_s1 + $0x1c8] sm:$0xff]   ;;  %v1451_v48 = vld [vmem:[%s1859_s1 + $0x1d0] sm:$0xff]   ;;  %v1453_v50 = vld [vmem:[%s1859_s1 + $0x158] sm:$0xff]  }
  0x10   :  { %1268 = vmatprep.subr.bf16.mxu0 %v1421_v16  ;;  %v1448_v45 = vld [vmem:[%s1859_s1 + $0x188] sm:$0xff]   ;;  %v1452_v49 = vld [vmem:[%s1859_s1 + $0x190] sm:$0xff]   ;;  %v1454_v51 = vld [vmem:[%s1859_s1 + $0x118] sm:$0xff]  }
  0x11   :  { %1289 = vmatpush3.bf16.msra.mxu1 %v1420_v15  ;;  %v1455_v52 = vld [vmem:[%s1859_s1 + $0x1d8] sm:$0xff]   ;;  %v1457_v54 = vld [vmem:[%s1859_s1 + $0x160] sm:$0xff]   ;;  %v1461_v58 = vld [vmem:[%s1859_s1 + $0x168] sm:$0xff]  }
  0x12   :  { %1290 = vmatprep.subr.bf16.mxu1 %v1423_v18  ;;  %v1456_v53 = vld [vmem:[%s1859_s1 + $0x198] sm:$0xff]   ;;  %v1458_v55 = vld [vmem:[%s1859_s1 + $0x120] sm:$0xff]   ;;  %v1462_v59 = vld [vmem:[%s1859_s1 + $0x128] sm:$0xff]  }
  0x13   :  { %1269 = vmatpush3.bf16.msra.mxu0 %v1422_v17  ;;  %v1459_v56 = vld [vmem:[%s1859_s1 + $0x1e0] sm:$0xff]   ;;  %v1463_v60 = vld [vmem:[%s1859_s1 + $0x1e8] sm:$0xff]   ;;  %v1465_v62 = vld [vmem:[%s1859_s1 + $0x170] sm:$0xff]  }
  0x14   :  { %1270 = vmatprep.subr.bf16.mxu0 %v1425_v20  ;;  %v1460_v57 = vld [vmem:[%s1859_s1 + $0x1a0] sm:$0xff]   ;;  %v1464_v61 = vld [vmem:[%s1859_s1 + $0x1a8] sm:$0xff]   ;;  %v1466_v63 = vld [vmem:[%s1859_s1 + $0x130] sm:$0xff]  }
  0x15   :  { %1291 = vmatpush3.bf16.msra.mxu1 %v1424_v19  ;;  %v1467_v0 = vld [vmem:[%s1859_s1 + $0x1f0] sm:$0xff]   ;;  %v1469_v2 = vld [vmem:[%s1859_s1 + $0x178] sm:$0xff]   ;;  %v1475_v9 = vld [vmem:[%s1859_s1 + $0x240] sm:$0xff]  }
  0x16   :  { %1292 = vmatprep.subr.bf16.mxu1 %v1427_v22  ;;  %v1468_v1 = vld [vmem:[%s1859_s1 + $0x1b0] sm:$0xff]   ;;  %v1470_v3 = vld [vmem:[%s1859_s1 + $0x138] sm:$0xff]   ;;  %v1478_v13 = vld [vmem:[%s1859_s1 + $0x200] sm:$0xff]  }
  0x17   :  { %1271 = vmatpush3.bf16.msra.mxu0 %v1426_v21  ;;  %v1471_v4 = vld [vmem:[%s1859_s1 + $0x1f8] sm:$0xff]   ;;  %v17_v6 = vld [vmem:[%s1860_s0 + $0x10] sm:$0xff]  ;;  %v1479_v14 = vld [vmem:[%s1859_s1 + $0x2c0] sm:$0xff]  }
  0x18   :  { %1272 = vmatprep.subr.bf16.mxu0 %v1429_v24  ;;  %v1472_v5 = vld [vmem:[%s1859_s1 + $0x1b8] sm:$0xff]   ;;  %v1152_v7 = vcombine.low %v17_v6, %v17_v6  ;;  %v1153_v8 = vcombine.high %v17_v6, %v17_v6  ;;  %v1480_v15 = vld [vmem:[%s1859_s1 + $0x280] sm:$0xff]   ;;  %v1481_v16 = vld [vmem:[%s1859_s1 + $0x248] sm:$0xff]  }
  0x19   :  { %1293 = vmatpush3.bf16.msra.mxu1 %v1428_v23  ;;  %v18_v10 = vld [vmem:[%s1860_s0 + $0x18] sm:$0xff]  ;;  %v1482_v17 = vld [vmem:[%s1859_s1 + $0x208] sm:$0xff]   ;;  %v1485_v20 = vld [vmem:[%s1859_s1 + $0x250] sm:$0xff]  }
  0x1a   :  { %1294 = vmatprep.subr.bf16.mxu1 %v1431_v26  ;;  %v1154_v11 = vcombine.low %v18_v10, %v18_v10  ;;  %v1155_v12 = vcombine.high %v18_v10, %v18_v10  ;;  %v1483_v18 = vld [vmem:[%s1859_s1 + $0x2c8] sm:$0xff]   ;;  %v1486_v21 = vld [vmem:[%s1859_s1 + $0x210] sm:$0xff]   ;;  %v1489_v24 = vld [vmem:[%s1859_s1 + $0x258] sm:$0xff]  }
  0x1b   :  { %1273 = vmatpush3.bf16.msra.mxu0 %v1430_v25  ;;  %v1484_v19 = vld [vmem:[%s1859_s1 + $0x288] sm:$0xff]   ;;  %v1487_v22 = vld [vmem:[%s1859_s1 + $0x2d0] sm:$0xff]   ;;  %v1490_v25 = vld [vmem:[%s1859_s1 + $0x218] sm:$0xff]  }
  0x1c   :  { %1274 = vmatprep.subr.bf16.mxu0 %v1433_v28  ;;  %v1488_v23 = vld [vmem:[%s1859_s1 + $0x290] sm:$0xff]   ;;  %v1491_v26 = vld [vmem:[%s1859_s1 + $0x2d8] sm:$0xff]   ;;  %v1493_v28 = vld [vmem:[%s1859_s1 + $0x260] sm:$0xff]  }
  0x1d   :  { %1295 = vmatpush3.bf16.msra.mxu1 %v1432_v27  ;;  %v1492_v27 = vld [vmem:[%s1859_s1 + $0x298] sm:$0xff]   ;;  %v1497_v32 = vld [vmem:[%s1859_s1 + $0x268] sm:$0xff]   ;;  %v1501_v36 = vld [vmem:[%s1859_s1 + $0x270] sm:$0xff]  }
  0x1e   :  { %1296 = vmatprep.subr.bf16.mxu1 %v1435_v30  ;;  %v1495_v30 = vld [vmem:[%s1859_s1 + $0x2e0] sm:$0xff]   ;;  %v1499_v34 = vld [vmem:[%s1859_s1 + $0x2e8] sm:$0xff]   ;;  %v1503_v38 = vld [vmem:[%s1859_s1 + $0x2f0] sm:$0xff]  }
  0x1f   :  { %1275 = vmatpush3.bf16.msra.mxu0 %v1434_v29  ;;  %v1494_v29 = vld [vmem:[%s1859_s1 + $0x220] sm:$0xff]  }
  0x20   :  { %1304 = vmatprep.subr.bf16.mxu0 %v1439_v35  ;;  %v1500_v35 = vld [vmem:[%s1859_s1 + $0x2a8] sm:$0xff]  }
  0x21   :  { %1297 = vmatpush3.bf16.msra.mxu1 %v1436_v31  ;;  %v1496_v31 = vld [vmem:[%s1859_s1 + $0x2a0] sm:$0xff]  }
  0x22   :  { %895 = vmatmul.mubr.bf16.vlgmr.msra.gmra.mrb[0].mxu0 %v1148_v33  ;;  %1326 = vmatprep.subr.bf16.mxu1 %v1443_v40  ;;  %v1498_v33 = vld [vmem:[%s1859_s1 + $0x228] sm:$0xff]   ;;  %v1505_v40 = vld [vmem:[%s1859_s1 + $0x278] sm:$0xff]  }
  0x23   :  { %1305 = vmatpush3.bf16.msra.mxu0 %v1442_v39  ;;  %974 = vmatprep.mubr.bf16.mxu0 %v1153_v8  ;;  %v1504_v39 = vld [vmem:[%s1859_s1 + $0x2b0] sm:$0xff]  }
  0x24   :  { %935 = vmatmul.mubr.bf16.vlgmr.msra.gmra.mrb[0].mxu1 %v1150_v37  ;;  %1306 = vmatprep.subr.bf16.mxu0 %v1445_v42  ;;  %v1502_v37 = vld [vmem:[%s1859_s1 + $0x230] sm:$0xff]   ;;  %v1507_v42 = vld [vmem:[%s1859_s1 + $0x2f8] sm:$0xff]  }
  0x25   :  { %1327 = vmatpush3.bf16.msra.mxu1 %v1444_v41  ;;  %1014 = vmatprep.mubr.bf16.mxu1 %v1155_v12  ;;  %v1506_v41 = vld [vmem:[%s1859_s1 + $0x238] sm:$0xff]  }
  0x26   :  { %1328 = vmatprep.subr.bf16.mxu1 %v1447_v44  ;;  %v19_v44 = vld [vmem:[%s1860_s0 + $0x20] sm:$0xff] }
  0x27   :  { %1307 = vmatpush3.bf16.msra.mxu0 %v1446_v43  ;;  %v1508_v43 = vld [vmem:[%s1859_s1 + $0x2b8] sm:$0xff]  }
  0x28   :  { %1308 = vmatprep.subr.bf16.mxu0 %v1449_v46  ;;  %v1156_v46 = vcombine.low %v19_v44, %v19_v44 }
  0x29   :  { %1329 = vmatpush3.bf16.msra.mxu1 %v1448_v45  ;;  %v20_v45 = vld [vmem:[%s1860_s0 + $0x28] sm:$0xff] }
  0x2a   :  { %1330 = vmatprep.subr.bf16.mxu1 %v1451_v48  ;;  %v1158_v48 = vcombine.low %v20_v45, %v20_v45 }
  0x2b   :  { %1309 = vmatpush3.bf16.msra.mxu0 %v1450_v47  ;;  %v1157_v47 = vcombine.high %v19_v44, %v19_v44 }
  0x2c   :  { %1310 = vmatprep.subr.bf16.mxu0 %v1453_v50  ;;  %v1513_v50 = vld [vmem:[%s1859_s1 + $0x300] sm:$0xff]  }
  0x2d   :  { %1331 = vmatpush3.bf16.msra.mxu1 %v1452_v49  ;;  %v1159_v49 = vcombine.high %v20_v45, %v20_v45 }
  0x2e   :  { %1332 = vmatprep.subr.bf16.mxu1 %v1455_v52  ;;  %v1514_v52 = vld [vmem:[%s1859_s1 + $0x308] sm:$0xff]  }
  0x2f   :  { %1311 = vmatpush3.bf16.msra.mxu0 %v1454_v51  ;;  %v1516_v51 = vmov 0.0  }
  0x30   :  { %1312 = vmatprep.subr.bf16.mxu0 %v1457_v54 }
  0x31   :  { %1333 = vmatpush3.bf16.msra.mxu1 %v1456_v53  ;;  %v1515_v53 = vld [vmem:[%s1860_s0 + $0x30] ss:$0 sps:$4 sm:$0xff]  }
  0x32   :  { %1334 = vmatprep.subr.bf16.mxu1 %v1459_v56 }
  0x33   :  { %1313 = vmatpush3.bf16.msra.mxu0 %v1458_v55  ;;  %v1147_v55 = vld [vmem:[%s1861_s2] ss:$0 sm:$0xff] }
  0x34   :  { %1314 = vmatprep.subr.bf16.mxu0 %v1461_v58 }
  0x35   :  { %1335 = vmatpush3.bf16.msra.mxu1 %v1460_v57 }
  0x36   :  { %1336 = vmatprep.subr.bf16.mxu1 %v1463_v60 }
  0x37   :  { %1315 = vmatpush3.bf16.msra.mxu0 %v1462_v59 }
  0x38   :  { %1316 = vmatprep.subr.bf16.mxu0 %v1465_v62 }
  0x39   :  { %1337 = vmatpush3.bf16.msra.mxu1 %v1464_v61 }
  0x3a   :  { %1338 = vmatprep.subr.bf16.mxu1 %v1467_v0 }
  0x3b   :  { %1317 = vmatpush3.bf16.msra.mxu0 %v1466_v63 }
  0x3c   :  { %1318 = vmatprep.subr.bf16.mxu0 %v1469_v2 }
  0x3d   :  { %1339 = vmatpush3.bf16.msra.mxu1 %v1468_v1 }
  0x3e   :  { %1340 = vmatprep.subr.bf16.mxu1 %v1471_v4 }
  0x3f   :  { %1319 = vmatpush3.bf16.msra.mxu0 %v1470_v3 }
  0x40   :  { %1348 = vmatprep.subr.bf16.mxu0 %v1475_v9 }
  0x41   :  { %1341 = vmatpush3.bf16.msra.mxu1 %v1472_v5 }
  0x42   :  { %975 = vmatmul.mubr.bf16.vlgmr.msra.gmra.mrb[4].mxu0 %v1152_v7  ;;  %1370 = vmatprep.subr.bf16.mxu1 %v1479_v14 }
  0x43   :  { %1349 = vmatpush3.bf16.msra.mxu0 %v1478_v13  ;;  %1054 = vmatprep.mubr.bf16.mxu0 %v1157_v47 }
  0x44   :  { %1015 = vmatmul.mubr.bf16.vlgmr.msra.gmra.mrb[4].mxu1 %v1154_v11  ;;  %1350 = vmatprep.subr.bf16.mxu0 %v1481_v16 }
  0x45   :  { %1371 = vmatpush3.bf16.msra.mxu1 %v1480_v15  ;;  %1094 = vmatprep.mubr.bf16.mxu1 %v1159_v49 }
  0x46   :  { %1372 = vmatprep.subr.bf16.mxu1 %v1483_v18 }
  0x47   :  { %1351 = vmatpush3.bf16.msra.mxu0 %v1482_v17 }
  0x48   :  { %1352 = vmatprep.subr.bf16.mxu0 %v1485_v20 }
  0x49   :  { %1373 = vmatpush3.bf16.msra.mxu1 %v1484_v19 }
  0x4a   :  { %1374 = vmatprep.subr.bf16.mxu1 %v1487_v22 }
  0x4b   :  { %1353 = vmatpush3.bf16.msra.mxu0 %v1486_v21 }
  0x4c   :  { %1354 = vmatprep.subr.bf16.mxu0 %v1489_v24 }
  0x4d   :  { %1375 = vmatpush3.bf16.msra.mxu1 %v1488_v23 }
  0x4e   :  { %1376 = vmatprep.subr.bf16.mxu1 %v1491_v26 }
  0x4f   :  { %1355 = vmatpush3.bf16.msra.mxu0 %v1490_v25 }
  0x50   :  { %1356 = vmatprep.subr.bf16.mxu0 %v1493_v28 }
  0x51   :  { %1377 = vmatpush3.bf16.msra.mxu1 %v1492_v27 }
  0x52   :  { %1378 = vmatprep.subr.bf16.mxu1 %v1495_v30 }
  0x53   :  { %1357 = vmatpush3.bf16.msra.mxu0 %v1494_v29 }
  0x54   :  { %1358 = vmatprep.subr.bf16.mxu0 %v1497_v32 }
  0x55   :  { %1379 = vmatpush3.bf16.msra.mxu1 %v1496_v31 }
  0x56   :  { %1380 = vmatprep.subr.bf16.mxu1 %v1499_v34 }
  0x57   :  { %1359 = vmatpush3.bf16.msra.mxu0 %v1498_v33 }
  0x58   :  { %1360 = vmatprep.subr.bf16.mxu0 %v1501_v36 }
  0x59   :  { %1381 = vmatpush3.bf16.msra.mxu1 %v1500_v35 }
  0x5a   :  { %1382 = vmatprep.subr.bf16.mxu1 %v1503_v38 }
  0x5b   :  { %1361 = vmatpush3.bf16.msra.mxu0 %v1502_v37 }
  0x5c   :  { %1362 = vmatprep.subr.bf16.mxu0 %v1505_v40 }
  0x5d   :  { %1383 = vmatpush3.bf16.msra.mxu1 %v1504_v39 }
  0x5e   :  { %1384 = vmatprep.subr.bf16.mxu1 %v1507_v42 }
  0x5f   :  { %1363 = vmatpush3.bf16.msra.mxu0 %v1506_v41 }
  0x60   :  { %1395 = vmatprep.subr.bf16.mxu0 %v1516_v51 }
  0x61   :  { %1385 = vmatpush3.bf16.msra.mxu1 %v1508_v43 }
  0x62   :  { %1055 = vmatmul.mubr.bf16.vlgmr.msra.gmra.mrb[8].mxu0 %v1156_v46 }
  0x63   :  { %1396 = vmatpush3.bf16.msra.mxu0 %v1513_v50  ;;  %1399 = vmatprep.mubr.msk.bf16.mxu0 %vm1517_vm0, %v1516_v51 }
  0x64   :  { %1095 = vmatmul.mubr.bf16.vlgmr.msra.gmra.mrb[8].mxu1 %v1158_v48  ;;  %1397 = vmatprep.subr.bf16.mxu0 %v1516_v51 }
  0x67   :  { %1398 = vmatpush3.bf16.msra.mxu0 %v1514_v52 }
  0x6a   :  { %1400 = vmatmul.mubr.msk.bf16.vlgmr.msra.gmra.mrb[12].mxu0 %vm858_vm1, %v1515_v53 }
  0xf5   :  { %v1276_v54 = vpop.f32.mrb[0].mxu0 }
  0xf6   :  { %v1277_v56 = vpop.f32.mrb[1].mxu0 }
  0xf7   :  { %v1278_v57 = vadd.f32 %v1277_v56, %v1276_v54  ;;  %v1279_v58 = vpop.f32.mrb[2].mxu0  ;;  %v1298_v59 = vpop.f32.mrb[0].mxu1 }
  0xf8   :  { %v1280_v60 = vpop.f32.mrb[3].mxu0  ;;  %v1299_v61 = vpop.f32.mrb[1].mxu1 }
  0xf9   :  { %v897_v62 = vadd.f32 %v1278_v57, %v1147_v55  ;;  %v1300_v63 = vadd.f32 %v1299_v61, %v1298_v59  ;;  %v1301_v0 = vpop.f32.mrb[2].mxu1 }
  0xfa   :  { %v1302_v1 = vpop.f32.mrb[3].mxu1 }
  0xfb   :  { %v937_v2 = vadd.f32 %v1300_v63, %v897_v62 }
 0x115   :  { %v1320_v3 = vpop.f32.mrb[4].mxu0 }
 0x116   :  { %v1321_v4 = vpop.f32.mrb[5].mxu0 }
 0x117   :  { %v1322_v5 = vadd.f32 %v1321_v4, %v1320_v3  ;;  %v1323_v6 = vpop.f32.mrb[6].mxu0  ;;  %v1342_v7 = vpop.f32.mrb[4].mxu1 }
 0x118   :  { %v1324_v8 = vpop.f32.mrb[7].mxu0  ;;  %v1343_v9 = vpop.f32.mrb[5].mxu1 }
 0x119   :  { %v977_v10 = vadd.f32 %v1322_v5, %v937_v2  ;;  %v1344_v11 = vadd.f32 %v1343_v9, %v1342_v7  ;;  %v1345_v12 = vpop.f32.mrb[6].mxu1 }
 0x11a   :  { %v1346_v13 = vpop.f32.mrb[7].mxu1 }
 0x11b   :  { %v1017_v14 = vadd.f32 %v1344_v11, %v977_v10 }
 0x135   :  { %v1364_v15 = vpop.f32.mrb[8].mxu0 }
 0x136   :  { %v1365_v16 = vpop.f32.mrb[9].mxu0 }
 0x137   :  { %v1386_v17 = vpop.f32.mrb[8].mxu1  ;;  %v1366_v18 = vadd.f32 %v1365_v16, %v1364_v15  ;;  %v1367_v19 = vpop.f32.mrb[10].mxu0 }
 0x138   :  { %v1387_v20 = vpop.f32.mrb[9].mxu1  ;;  %v1368_v22 = vpop.f32.mrb[11].mxu0 }
 0x139   :  { %v1388_v21 = vadd.f32 %v1387_v20, %v1386_v17  ;;  %v1389_v23 = vpop.f32.mrb[10].mxu1  ;;  %v1057_v24 = vadd.f32 %v1366_v18, %v1017_v14 }
 0x13a   :  { %v1390_v25 = vpop.f32.mrb[11].mxu1 }
 0x13b   :  { %v1097_v26 = vadd.f32 %v1388_v21, %v1057_v24 }
 0x13d   :  { %v1136_v27 = vpop.f32.mrb[12].mxu0 }
 0x13e   :  { %v1137_v28 = vadd.f32 %v1136_v27, %v1097_v26  ;;  %v1401_v29 = vpop.f32.mrb[13].mxu0 }
 0x13f   :  { %v1139_v30 = vpop.f32.mrb[14].mxu0 }
 0x140   :  { %1142 = vst [vmem:[%s1862_s3] sm:$0xff] %v1137_v28  ;;  %v1402_v31 = vpop.f32.mrb[15].mxu0 }

</bundles_post_ra>
